<compile_context>
chip_gen: v6e
topology: v6e:2x2x1
jax: 0.10.0
libtpu: 0.0.40
codegen_flags: <defaults>
</compile_context>

<pallas_src>
import functools

import jax
import jax.numpy as jnp
from jax import lax
from jax.experimental import pallas as pl
from jax.experimental.pallas import tpu as pltpu


def _round_up(v, m):
    return ((v + m - 1) // m) * m


def _pad_to(a, shape):
    pads = [(0, t - s) for s, t in zip(a.shape, shape)]
    if any(p for _, p in pads):
        a = jnp.pad(a, pads)
    return a


def _rnn_kernel(x_ref, wih0_ref, whh_ref, *rest,
                num_layers, t_block, batch_pad):
    """One grid step = one time block of t_block steps.

    x_ref:    (t_block*batch_pad, input_size)   bf16, time-major rows
    wih0_ref: (input_size, hidden_pad)          bf16
    whh_ref:  (L, hidden_pad, hidden_pad)       bf16
    rest = ([wih_rest_ref], b_ref, out_ref, h_ref, z0_ref)
    """
    if num_layers > 1:
        wihr_ref, b_ref, out_ref, h_ref, z0_ref = rest
    else:
        b_ref, out_ref, h_ref, z0_ref = rest
        wihr_ref = None

    # Persistent hidden state: zero it at the first time block of the sweep.
    @pl.when(pl.program_id(0) == 0)
    def _():
        h_ref[...] = jnp.zeros_like(h_ref)

    w_dtype = wih0_ref.dtype
    hidden_pad = h_ref.shape[-1]

    # ---- Hoisted layer-0 input projection: one MXU GEMM for the whole time
    # block (M = t_block*batch rows) instead of t_block tiny dependent GEMMs.
    # Layer-0 bias is folded in here.
    b0 = b_ref[pl.ds(0, 1), :]                               # (1, hidden_pad)
    z0_ref[...] = jnp.dot(x_ref[...], wih0_ref[...],
                          preferred_element_type=jnp.float32) + b0

    # ---- Bias broadcasts for layers 1..L-1 hoisted out of the time loop
    # (JAX does not CSE broadcast_in_dim).
    b_bc = [jnp.broadcast_to(b_ref[pl.ds(i, 1), :], (batch_pad, hidden_pad))
            for i in range(1, num_layers)]

    # ---- Hidden state: read VMEM scratch once, carry in loop registers.
    hs0 = tuple(h_ref[i] for i in range(num_layers))

    def step(t_local, hs):
        # All recurrent dots depend only on step t-1 state -> issue them all
        # up front so they overlap the dependent tanh chain across layers.
        rec = [jnp.dot(hs[i].astype(w_dtype), whh_ref[i],
                       preferred_element_type=jnp.float32)
               for i in range(num_layers)]

        row = pl.multiple_of(t_local * batch_pad, batch_pad)
        cur = jnp.tanh(z0_ref[pl.ds(row, batch_pad), :] + rec[0])   # layer 0
        new_hs = [cur]
        for i in range(1, num_layers):                              # unrolled
            z = (jnp.dot(cur.astype(w_dtype), wihr_ref[i - 1],
                         preferred_element_type=jnp.float32)
                 + rec[i] + b_bc[i - 1])
            cur = jnp.tanh(z)
            new_hs.append(cur)

        out_ref[t_local] = cur.astype(out_ref.dtype)
        return tuple(new_hs)

    unroll = t_block if t_block <= 16 else 8
    hs_final = lax.fori_loop(0, t_block, step, hs0, unroll=unroll)

    # ---- Write hidden state back once per block.
    for i in range(num_layers):
        h_ref[i] = hs_final[i]


def rnn_with_checkpoint_forward(x, params, *, t_block=None,
                                compute_dtype=jnp.bfloat16):
    """Pallas forward of RNNWithCheckpoint.

    x: (seq_len, batch, input_size) float32
    params: dict with
      wih0:     (input_size, hidden)           -- layer 0 W_ih, pre-transposed
      wih_rest: (max(L-1,1), hidden, hidden)   -- layers 1..L-1 W_ih, transposed
      whh:      (L, hidden, hidden)            -- W_hh per layer, transposed
      bih, bhh: (L, hidden)
    returns: (seq_len, batch, hidden) float32

    Pass compute_dtype=jnp.float32 for an f32-weight fallback (long sequences /
    tight tolerances).
    """
    seq_len, batch, input_size = x.shape
    num_layers, hidden = params["bih"].shape

    # ---- Pad hidden to a lane-dense multiple of 128 and batch to a sublane
    # multiple of 8.  Zero padding is inert: padded pre-activations are 0,
    # tanh(0)=0, and zero hidden columns feed zero weight rows.
    hidden_pad = _round_up(hidden, 128)
    batch_pad = _round_up(batch, 8)
    cd_bytes = jnp.dtype(compute_dtype).itemsize

    wih0 = _pad_to(params["wih0"], (input_size, hidden_pad)).astype(compute_dtype)
    whh = _pad_to(params["whh"],
                  (num_layers, hidden_pad, hidden_pad)).astype(compute_dtype)
    b_sum = _pad_to(params["bih"] + params["bhh"],
                    (num_layers, hidden_pad)).astype(jnp.float32)
    wih_rest = None
    if num_layers > 1:
        wih_rest = _pad_to(params["wih_rest"][:num_layers - 1],
                           (num_layers - 1, hidden_pad, hidden_pad)
                           ).astype(compute_dtype)

    # ---- VMEM budget (per-generation) and t_block auto-sizing.
    try:
        vmem_cap = int(pltpu.get_tpu_info().vmem_capacity_bytes)
    except Exception:
        vmem_cap = 64 * 1024 * 1024        # conservative (v7x per-TensorCore)
    budget = int(vmem_cap * 0.85)

    weight_bytes = (wih0.size + whh.size
                    + (wih_rest.size if wih_rest is not None else 0)) * cd_bytes
    weight_bytes += b_sum.size * 4
    # fixed = double-buffered weights + persistent h scratch + compiler headroom
    fixed = 2 * weight_bytes + num_layers * batch_pad * hidden_pad * 4 + (4 << 20)
    # per time step: 2x buffered x block + 2x buffered out block + z0 scratch
    per_t = batch_pad * (2 * input_size * cd_bytes + 3 * hidden_pad * 4)

    if t_block is None:
        t_fit = max((budget - fixed) // per_t, 1)
        t_block = int(max(8, min(t_fit, 256, seq_len)))
    nt = pl.cdiv(seq_len, t_block)
    seq_pad = nt * t_block

    needed = fixed + per_t * t_block
    vmem_limit = int(min(max(needed, 32 << 20), int(vmem_cap * 0.9)))

    # ---- Input prep: pad seq/batch, flatten time-major to 2-D, cast to bf16
    # in the wrapper (halves x DMA bytes, removes per-step casts/reshapes).
    x_p = x
    if seq_pad != seq_len or batch_pad != batch:
        x_p = jnp.pad(x, ((0, seq_pad - seq_len), (0, batch_pad - batch), (0, 0)))
    x_flat = x_p.reshape(seq_pad * batch_pad, input_size).astype(compute_dtype)

    in_specs = [
        pl.BlockSpec((t_block * batch_pad, input_size), lambda tt: (tt, 0)),
        pl.BlockSpec(wih0.shape, lambda tt: (0, 0)),
        pl.BlockSpec(whh.shape, lambda tt: (0, 0, 0)),
    ]
    args = [x_flat, wih0, whh]
    if num_layers > 1:
        in_specs.append(pl.BlockSpec(wih_rest.shape, lambda tt: (0, 0, 0)))
        args.append(wih_rest)
    in_specs.append(pl.BlockSpec(b_sum.shape, lambda tt: (0, 0)))
    args.append(b_sum)

    kernel = functools.partial(_rnn_kernel, num_layers=num_layers,
                               t_block=t_block, batch_pad=batch_pad)

    out = pl.pallas_call(
        kernel,
        out_shape=jax.ShapeDtypeStruct((seq_pad, batch_pad, hidden_pad),
                                       jnp.float32),
        grid_spec=pltpu.PrefetchScalarGridSpec(
            num_scalar_prefetch=0,
            grid=(nt,),
            in_specs=in_specs,
            out_specs=pl.BlockSpec((t_block, batch_pad, hidden_pad),
                                   lambda tt: (tt, 0, 0)),
            scratch_shapes=[
                # persistent hidden state across time blocks
                pltpu.VMEM((num_layers, batch_pad, hidden_pad), jnp.float32),
                # hoisted layer-0 pre-activations for the current time block
                pltpu.VMEM((t_block * batch_pad, hidden_pad), jnp.float32),
            ],
        ),
        compiler_params=pltpu.CompilerParams(
            dimension_semantics=("arbitrary",),
            vmem_limit_bytes=vmem_limit,
        ),
    )(*args)

    return out[:seq_len, :batch, :hidden]


def rnn_reference(x, params):
    """Pure-JAX f32 reference matching nn.RNNCell (tanh) stacking semantics."""
    seq_len, batch, _ = x.shape
    num_layers, hidden = params["bih"].shape
    h = [jnp.zeros((batch, hidden), jnp.float32) for _ in range(num_layers)]
    outs = []
    for t in range(seq_len):
        cur = x[t]
        for i in range(num_layers):
            w_ih = params["wih0"] if i == 0 else params["wih_rest"][i - 1]
            new_h = jnp.tanh(cur @ w_ih + params["bih"][i]
                             + h[i] @ params["whh"][i] + params["bhh"][i])
            h[i] = new_h
            cur = new_h
        outs.append(cur)
    return jnp.stack(outs)


def init_params(key, input_size, hidden_size, num_layers):
    """uniform(-1/sqrt(hidden), 1/sqrt(hidden)) like torch.nn.RNNCell.

    Weights stored pre-transposed (in_features, hidden) so the kernel does x @ W.
    """
    bound = 1.0 / jnp.sqrt(hidden_size)
    keys = jax.random.split(key, 6)
    wih0 = jax.random.uniform(keys[0], (input_size, hidden_size),
                              jnp.float32, -bound, bound)
    n_rest = max(num_layers - 1, 1)
    wih_rest = jax.random.uniform(keys[1], (n_rest, hidden_size, hidden_size),
                                  jnp.float32, -bound, bound)
    whh = jax.random.uniform(keys[2], (num_layers, hidden_size, hidden_size),
                             jnp.float32, -bound, bound)
    bih = jax.random.uniform(keys[3], (num_layers, hidden_size),
                             jnp.float32, -bound, bound)
    bhh = jax.random.uniform(keys[4], (num_layers, hidden_size),
                             jnp.float32, -bound, bound)
    return {"wih0": wih0, "wih_rest": wih_rest, "whh": whh,
            "bih": bih, "bhh": bhh}


if __name__ == "__main__":
    seq_len, batch, input_size = 8, 2, 16
    hidden_size, num_layers = 32, 2

    key = jax.random.PRNGKey(0)
    k_x, k_p = jax.random.split(key)
    x = jax.random.normal(k_x, (seq_len, batch, input_size), jnp.float32)
    params = init_params(k_p, input_size, hidden_size, num_layers)

    out = rnn_with_checkpoint_forward(x, params)   # bf16 weights, f32 state
    out = jax.block_until_ready(out)

    ref = rnn_reference(x, params)                 # pure f32 reference
    assert out.shape == (seq_len, batch, hidden_size)
    # bf16 matmul operands with f32 accumulation & f32 recurrent state:
    # loosened tolerance vs the pure-f32 reference (pass compute_dtype=f32
    # for a bit-tight fallback).
    assert jnp.allclose(out, ref, atol=2e-2, rtol=2e-2), "mismatch vs reference"

    print("KERNEL_OK")
</pallas_src>

<mosaic_0001>
module attributes {stable_mosaic.version = 11 : i64} {
  func.func @_rnn_kernel(%arg0: i32, %arg1: memref<64x16xbf16, #tpu.memory_space<vmem>>, %arg2: memref<16x128xbf16, #tpu.memory_space<vmem>>, %arg3: memref<2x128x128xbf16, #tpu.memory_space<vmem>>, %arg4: memref<1x128x128xbf16, #tpu.memory_space<vmem>>, %arg5: memref<2x128xf32, #tpu.memory_space<vmem>>, %arg6: memref<8x8x128xf32, #tpu.memory_space<vmem>>, %arg7: memref<2x8x128xf32, #tpu.memory_space<vmem>>, %arg8: memref<64x128xf32, #tpu.memory_space<vmem>>) attributes {dimension_semantics = [#tpu.dimension_semantics<arbitrary>], iteration_bounds = array<i64: 1>, scalar_prefetch = 0 : i64, scratch_operands = 2 : i64, tpu.core_type = #tpu.core_type<tc>, window_params = [{transform_indices = @transform_0, window_bounds = array<i64: 64, 16>}, {pipeline_mode = #tpu.pipeline_mode<synchronous>, transform_indices = @transform_1, window_bounds = array<i64: 16, 128>}, {pipeline_mode = #tpu.pipeline_mode<synchronous>, transform_indices = @transform_2, window_bounds = array<i64: 2, 128, 128>}, {pipeline_mode = #tpu.pipeline_mode<synchronous>, transform_indices = @transform_3, window_bounds = array<i64: 1, 128, 128>}, {pipeline_mode = #tpu.pipeline_mode<synchronous>, transform_indices = @transform_4, window_bounds = array<i64: 2, 128>}, {transform_indices = @transform_5, window_bounds = array<i64: 8, 8, 128>}]} {
    %c0_i32 = arith.constant 0 : i32
    %0 = arith.cmpi eq, %arg0, %c0_i32 : i32
    %1 = arith.extui %0 : i1 to i32
    %c0_i32_0 = arith.constant 0 : i32
    %2 = arith.cmpi ne, %1, %c0_i32_0 : i32
    scf.if %2 {
      %cst_150 = arith.constant 0.000000e+00 : f32
      %223 = vector.broadcast %cst_150 : f32 to vector<2x8x128xf32>
      %c0_151 = arith.constant 0 : index
      %c0_152 = arith.constant 0 : index
      %c0_153 = arith.constant 0 : index
      %224 = vector.load %arg7[%c0_151, %c0_152, %c0_153] : memref<2x8x128xf32, #tpu.memory_space<vmem>>, vector<2x8x128xf32>
      tpu.vector_store %arg7[%c0_151, %c0_152, %c0_153], %223 {strides = array<i32>} : memref<2x8x128xf32, #tpu.memory_space<vmem>>, vector<2x8x128xf32>,
    } else {
    }
    %c0 = arith.constant 0 : index
    %c0_1 = arith.constant 0 : index
    %3 = vector.load %arg5[%c0, %c0_1] : memref<2x128xf32, #tpu.memory_space<vmem>>, vector<1x128xf32>
    %c0_2 = arith.constant 0 : index
    %c0_3 = arith.constant 0 : index
    %4 = vector.load %arg1[%c0_2, %c0_3] : memref<64x16xbf16, #tpu.memory_space<vmem>>, vector<64x16xbf16>
    %c0_4 = arith.constant 0 : index
    %c0_5 = arith.constant 0 : index
    %5 = vector.load %arg2[%c0_4, %c0_5] : memref<16x128xbf16, #tpu.memory_space<vmem>>, vector<16x128xbf16>
    %cst = arith.constant dense<0.000000e+00> : vector<64x128xf32>
    %6 = tpu.matmul %4, %5, %cst {dimension_numbers = #tpu.dot_dimension_numbers<[1], [0], [0], [1], [0, 0, 1, 1], [], []>} : vector<64x16xbf16>, vector<16x128xbf16>, vector<64x128xf32> -> vector<64x128xf32>
    %7 = vector.broadcast %3 : vector<1x128xf32> to vector<64x128xf32>
    %8 = arith.addf %6, %7 : vector<64x128xf32>
    %c0_6 = arith.constant 0 : index
    %c0_7 = arith.constant 0 : index
    %9 = vector.load %arg8[%c0_6, %c0_7] : memref<64x128xf32, #tpu.memory_space<vmem>>, vector<64x128xf32>
    tpu.vector_store %arg8[%c0_6, %c0_7], %8 {strides = array<i32>} : memref<64x128xf32, #tpu.memory_space<vmem>>, vector<64x128xf32>,
    %c1 = arith.constant 1 : index
    %c0_8 = arith.constant 0 : index
    %10 = vector.load %arg5[%c1, %c0_8] : memref<2x128xf32, #tpu.memory_space<vmem>>, vector<1x128xf32>
    %11 = vector.shape_cast %10 : vector<1x128xf32> to vector<1x128xf32>
    %12 = vector.broadcast %11 : vector<1x128xf32> to vector<8x128xf32>
    %c0_9 = arith.constant 0 : index
    %c0_10 = arith.constant 0 : index
    %c0_11 = arith.constant 0 : index
    %13 = vector.load %arg7[%c0_9, %c0_10, %c0_11] : memref<2x8x128xf32, #tpu.memory_space<vmem>>, vector<1x8x128xf32>
    %14 = vector.shape_cast %13 : vector<1x8x128xf32> to vector<8x128xf32>
    %c1_12 = arith.constant 1 : index
    %c0_13 = arith.constant 0 : index
    %c0_14 = arith.constant 0 : index
    %15 = vector.load %arg7[%c1_12, %c0_13, %c0_14] : memref<2x8x128xf32, #tpu.memory_space<vmem>>, vector<1x8x128xf32>
    %16 = vector.shape_cast %15 : vector<1x8x128xf32> to vector<8x128xf32>
    %c0_i32_15 = arith.constant 0 : i32
    %17 = arith.truncf %14 : vector<8x128xf32> to vector<8x128xbf16>
    %c0_16 = arith.constant 0 : index
    %c0_17 = arith.constant 0 : index
    %c0_18 = arith.constant 0 : index
    %18 = vector.load %arg3[%c0_16, %c0_17, %c0_18] : memref<2x128x128xbf16, #tpu.memory_space<vmem>>, vector<1x128x128xbf16>
    %19 = vector.shape_cast %18 : vector<1x128x128xbf16> to vector<128x128xbf16>
    %cst_19 = arith.constant dense<0.000000e+00> : vector<8x128xf32>
    %20 = tpu.matmul %17, %19, %cst_19 {dimension_numbers = #tpu.dot_dimension_numbers<[1], [0], [0], [1], [0, 0, 1, 1], [], []>} : vector<8x128xbf16>, vector<128x128xbf16>, vector<8x128xf32> -> vector<8x128xf32>
    %21 = arith.truncf %16 : vector<8x128xf32> to vector<8x128xbf16>
    %c1_20 = arith.constant 1 : index
    %c0_21 = arith.constant 0 : index
    %c0_22 = arith.constant 0 : index
    %22 = vector.load %arg3[%c1_20, %c0_21, %c0_22] : memref<2x128x128xbf16, #tpu.memory_space<vmem>>, vector<1x128x128xbf16>
    %23 = vector.shape_cast %22 : vector<1x128x128xbf16> to vector<128x128xbf16>
    %cst_23 = arith.constant dense<0.000000e+00> : vector<8x128xf32>
    %24 = tpu.matmul %21, %23, %cst_23 {dimension_numbers = #tpu.dot_dimension_numbers<[1], [0], [0], [1], [0, 0, 1, 1], [], []>} : vector<8x128xbf16>, vector<128x128xbf16>, vector<8x128xf32> -> vector<8x128xf32>
    %c8_i32 = arith.constant 8 : i32
    %25 = arith.muli %c0_i32_15, %c8_i32 : i32
    %26 = tpu.assume_multiple %25, 8 : i32
    %27 = arith.index_cast %26 : i32 to index
    %c0_24 = arith.constant 0 : index
    %28 = vector.load %arg8[%27, %c0_24] : memref<64x128xf32, #tpu.memory_space<vmem>>, vector<8x128xf32>
    %29 = arith.addf %28, %20 : vector<8x128xf32>
    %30 = math.tanh %29 : vector<8x128xf32>
    %31 = arith.truncf %30 : vector<8x128xf32> to vector<8x128xbf16>
    %c0_25 = arith.constant 0 : index
    %c0_26 = arith.constant 0 : index
    %c0_27 = arith.constant 0 : index
    %32 = vector.load %arg4[%c0_25, %c0_26, %c0_27] : memref<1x128x128xbf16, #tpu.memory_space<vmem>>, vector<1x128x128xbf16>
    %33 = vector.shape_cast %32 : vector<1x128x128xbf16> to vector<128x128xbf16>
    %cst_28 = arith.constant dense<0.000000e+00> : vector<8x128xf32>
    %34 = tpu.matmul %31, %33, %cst_28 {dimension_numbers = #tpu.dot_dimension_numbers<[1], [0], [0], [1], [0, 0, 1, 1], [], []>} : vector<8x128xbf16>, vector<128x128xbf16>, vector<8x128xf32> -> vector<8x128xf32>
    %35 = arith.addf %34, %24 : vector<8x128xf32>
    %36 = arith.addf %35, %12 : vector<8x128xf32>
    %37 = math.tanh %36 : vector<8x128xf32>
    %38 = arith.index_cast %c0_i32_15 : i32 to index
    %c0_29 = arith.constant 0 : index
    %c0_30 = arith.constant 0 : index
    %39 = vector.load %arg6[%38, %c0_29, %c0_30] : memref<8x8x128xf32, #tpu.memory_space<vmem>>, vector<1x8x128xf32>
    %40 = vector.shape_cast %39 : vector<1x8x128xf32> to vector<8x128xf32>
    %41 = vector.shape_cast %37 : vector<8x128xf32> to vector<1x8x128xf32>
    tpu.vector_store %arg6[%38, %c0_29, %c0_30], %41 {strides = array<i32>} : memref<8x8x128xf32, #tpu.memory_space<vmem>>, vector<1x8x128xf32>,
    %c1_i32 = arith.constant 1 : i32
    %42 = arith.truncf %30 : vector<8x128xf32> to vector<8x128xbf16>
    %c0_31 = arith.constant 0 : index
    %c0_32 = arith.constant 0 : index
    %c0_33 = arith.constant 0 : index
    %43 = vector.load %arg3[%c0_31, %c0_32, %c0_33] : memref<2x128x128xbf16, #tpu.memory_space<vmem>>, vector<1x128x128xbf16>
    %44 = vector.shape_cast %43 : vector<1x128x128xbf16> to vector<128x128xbf16>
    %cst_34 = arith.constant dense<0.000000e+00> : vector<8x128xf32>
    %45 = tpu.matmul %42, %44, %cst_34 {dimension_numbers = #tpu.dot_dimension_numbers<[1], [0], [0], [1], [0, 0, 1, 1], [], []>} : vector<8x128xbf16>, vector<128x128xbf16>, vector<8x128xf32> -> vector<8x128xf32>
    %46 = arith.truncf %37 : vector<8x128xf32> to vector<8x128xbf16>
    %c1_35 = arith.constant 1 : index
    %c0_36 = arith.constant 0 : index
    %c0_37 = arith.constant 0 : index
    %47 = vector.load %arg3[%c1_35, %c0_36, %c0_37] : memref<2x128x128xbf16, #tpu.memory_space<vmem>>, vector<1x128x128xbf16>
    %48 = vector.shape_cast %47 : vector<1x128x128xbf16> to vector<128x128xbf16>
    %cst_38 = arith.constant dense<0.000000e+00> : vector<8x128xf32>
    %49 = tpu.matmul %46, %48, %cst_38 {dimension_numbers = #tpu.dot_dimension_numbers<[1], [0], [0], [1], [0, 0, 1, 1], [], []>} : vector<8x128xbf16>, vector<128x128xbf16>, vector<8x128xf32> -> vector<8x128xf32>
    %c8_i32_39 = arith.constant 8 : i32
    %50 = arith.muli %c1_i32, %c8_i32_39 : i32
    %51 = tpu.assume_multiple %50, 8 : i32
    %52 = arith.index_cast %51 : i32 to index
    %c0_40 = arith.constant 0 : index
    %53 = vector.load %arg8[%52, %c0_40] : memref<64x128xf32, #tpu.memory_space<vmem>>, vector<8x128xf32>
    %54 = arith.addf %53, %45 : vector<8x128xf32>
    %55 = math.tanh %54 : vector<8x128xf32>
    %56 = arith.truncf %55 : vector<8x128xf32> to vector<8x128xbf16>
    %c0_41 = arith.constant 0 : index
    %c0_42 = arith.constant 0 : index
    %c0_43 = arith.constant 0 : index
    %57 = vector.load %arg4[%c0_41, %c0_42, %c0_43] : memref<1x128x128xbf16, #tpu.memory_space<vmem>>, vector<1x128x128xbf16>
    %58 = vector.shape_cast %57 : vector<1x128x128xbf16> to vector<128x128xbf16>
    %cst_44 = arith.constant dense<0.000000e+00> : vector<8x128xf32>
    %59 = tpu.matmul %56, %58, %cst_44 {dimension_numbers = #tpu.dot_dimension_numbers<[1], [0], [0], [1], [0, 0, 1, 1], [], []>} : vector<8x128xbf16>, vector<128x128xbf16>, vector<8x128xf32> -> vector<8x128xf32>
    %60 = arith.addf %59, %49 : vector<8x128xf32>
    %61 = arith.addf %60, %12 : vector<8x128xf32>
    %62 = math.tanh %61 : vector<8x128xf32>
    %63 = arith.index_cast %c1_i32 : i32 to index
    %c0_45 = arith.constant 0 : index
    %c0_46 = arith.constant 0 : index
    %64 = vector.load %arg6[%63, %c0_45, %c0_46] : memref<8x8x128xf32, #tpu.memory_space<vmem>>, vector<1x8x128xf32>
    %65 = vector.shape_cast %64 : vector<1x8x128xf32> to vector<8x128xf32>
    %66 = vector.shape_cast %62 : vector<8x128xf32> to vector<1x8x128xf32>
    tpu.vector_store %arg6[%63, %c0_45, %c0_46], %66 {strides = array<i32>} : memref<8x8x128xf32, #tpu.memory_space<vmem>>, vector<1x8x128xf32>,
    %c2_i32 = arith.constant 2 : i32
    %67 = arith.truncf %55 : vector<8x128xf32> to vector<8x128xbf16>
    %c0_47 = arith.constant 0 : index
    %c0_48 = arith.constant 0 : index
    %c0_49 = arith.constant 0 : index
    %68 = vector.load %arg3[%c0_47, %c0_48, %c0_49] : memref<2x128x128xbf16, #tpu.memory_space<vmem>>, vector<1x128x128xbf16>
    %69 = vector.shape_cast %68 : vector<1x128x128xbf16> to vector<128x128xbf16>
    %cst_50 = arith.constant dense<0.000000e+00> : vector<8x128xf32>
    %70 = tpu.matmul %67, %69, %cst_50 {dimension_numbers = #tpu.dot_dimension_numbers<[1], [0], [0], [1], [0, 0, 1, 1], [], []>} : vector<8x128xbf16>, vector<128x128xbf16>, vector<8x128xf32> -> vector<8x128xf32>
    %71 = arith.truncf %62 : vector<8x128xf32> to vector<8x128xbf16>
    %c1_51 = arith.constant 1 : index
    %c0_52 = arith.constant 0 : index
    %c0_53 = arith.constant 0 : index
    %72 = vector.load %arg3[%c1_51, %c0_52, %c0_53] : memref<2x128x128xbf16, #tpu.memory_space<vmem>>, vector<1x128x128xbf16>
    %73 = vector.shape_cast %72 : vector<1x128x128xbf16> to vector<128x128xbf16>
    %cst_54 = arith.constant dense<0.000000e+00> : vector<8x128xf32>
    %74 = tpu.matmul %71, %73, %cst_54 {dimension_numbers = #tpu.dot_dimension_numbers<[1], [0], [0], [1], [0, 0, 1, 1], [], []>} : vector<8x128xbf16>, vector<128x128xbf16>, vector<8x128xf32> -> vector<8x128xf32>
    %c8_i32_55 = arith.constant 8 : i32
    %75 = arith.muli %c2_i32, %c8_i32_55 : i32
    %76 = tpu.assume_multiple %75, 8 : i32
    %77 = arith.index_cast %76 : i32 to index
    %c0_56 = arith.constant 0 : index
    %78 = vector.load %arg8[%77, %c0_56] : memref<64x128xf32, #tpu.memory_space<vmem>>, vector<8x128xf32>
    %79 = arith.addf %78, %70 : vector<8x128xf32>
    %80 = math.tanh %79 : vector<8x128xf32>
    %81 = arith.truncf %80 : vector<8x128xf32> to vector<8x128xbf16>
    %c0_57 = arith.constant 0 : index
    %c0_58 = arith.constant 0 : index
    %c0_59 = arith.constant 0 : index
    %82 = vector.load %arg4[%c0_57, %c0_58, %c0_59] : memref<1x128x128xbf16, #tpu.memory_space<vmem>>, vector<1x128x128xbf16>
    %83 = vector.shape_cast %82 : vector<1x128x128xbf16> to vector<128x128xbf16>
    %cst_60 = arith.constant dense<0.000000e+00> : vector<8x128xf32>
    %84 = tpu.matmul %81, %83, %cst_60 {dimension_numbers = #tpu.dot_dimension_numbers<[1], [0], [0], [1], [0, 0, 1, 1], [], []>} : vector<8x128xbf16>, vector<128x128xbf16>, vector<8x128xf32> -> vector<8x128xf32>
    %85 = arith.addf %84, %74 : vector<8x128xf32>
    %86 = arith.addf %85, %12 : vector<8x128xf32>
    %87 = math.tanh %86 : vector<8x128xf32>
    %88 = arith.index_cast %c2_i32 : i32 to index
    %c0_61 = arith.constant 0 : index
    %c0_62 = arith.constant 0 : index
    %89 = vector.load %arg6[%88, %c0_61, %c0_62] : memref<8x8x128xf32, #tpu.memory_space<vmem>>, vector<1x8x128xf32>
    %90 = vector.shape_cast %89 : vector<1x8x128xf32> to vector<8x128xf32>
    %91 = vector.shape_cast %87 : vector<8x128xf32> to vector<1x8x128xf32>
    tpu.vector_store %arg6[%88, %c0_61, %c0_62], %91 {strides = array<i32>} : memref<8x8x128xf32, #tpu.memory_space<vmem>>, vector<1x8x128xf32>,
    %c3_i32 = arith.constant 3 : i32
    %92 = arith.truncf %80 : vector<8x128xf32> to vector<8x128xbf16>
    %c0_63 = arith.constant 0 : index
    %c0_64 = arith.constant 0 : index
    %c0_65 = arith.constant 0 : index
    %93 = vector.load %arg3[%c0_63, %c0_64, %c0_65] : memref<2x128x128xbf16, #tpu.memory_space<vmem>>, vector<1x128x128xbf16>
    %94 = vector.shape_cast %93 : vector<1x128x128xbf16> to vector<128x128xbf16>
    %cst_66 = arith.constant dense<0.000000e+00> : vector<8x128xf32>
    %95 = tpu.matmul %92, %94, %cst_66 {dimension_numbers = #tpu.dot_dimension_numbers<[1], [0], [0], [1], [0, 0, 1, 1], [], []>} : vector<8x128xbf16>, vector<128x128xbf16>, vector<8x128xf32> -> vector<8x128xf32>
    %96 = arith.truncf %87 : vector<8x128xf32> to vector<8x128xbf16>
    %c1_67 = arith.constant 1 : index
    %c0_68 = arith.constant 0 : index
    %c0_69 = arith.constant 0 : index
    %97 = vector.load %arg3[%c1_67, %c0_68, %c0_69] : memref<2x128x128xbf16, #tpu.memory_space<vmem>>, vector<1x128x128xbf16>
    %98 = vector.shape_cast %97 : vector<1x128x128xbf16> to vector<128x128xbf16>
    %cst_70 = arith.constant dense<0.000000e+00> : vector<8x128xf32>
    %99 = tpu.matmul %96, %98, %cst_70 {dimension_numbers = #tpu.dot_dimension_numbers<[1], [0], [0], [1], [0, 0, 1, 1], [], []>} : vector<8x128xbf16>, vector<128x128xbf16>, vector<8x128xf32> -> vector<8x128xf32>
    %c8_i32_71 = arith.constant 8 : i32
    %100 = arith.muli %c3_i32, %c8_i32_71 : i32
    %101 = tpu.assume_multiple %100, 8 : i32
    %102 = arith.index_cast %101 : i32 to index
    %c0_72 = arith.constant 0 : index
    %103 = vector.load %arg8[%102, %c0_72] : memref<64x128xf32, #tpu.memory_space<vmem>>, vector<8x128xf32>
    %104 = arith.addf %103, %95 : vector<8x128xf32>
    %105 = math.tanh %104 : vector<8x128xf32>
    %106 = arith.truncf %105 : vector<8x128xf32> to vector<8x128xbf16>
    %c0_73 = arith.constant 0 : index
    %c0_74 = arith.constant 0 : index
    %c0_75 = arith.constant 0 : index
    %107 = vector.load %arg4[%c0_73, %c0_74, %c0_75] : memref<1x128x128xbf16, #tpu.memory_space<vmem>>, vector<1x128x128xbf16>
    %108 = vector.shape_cast %107 : vector<1x128x128xbf16> to vector<128x128xbf16>
    %cst_76 = arith.constant dense<0.000000e+00> : vector<8x128xf32>
    %109 = tpu.matmul %106, %108, %cst_76 {dimension_numbers = #tpu.dot_dimension_numbers<[1], [0], [0], [1], [0, 0, 1, 1], [], []>} : vector<8x128xbf16>, vector<128x128xbf16>, vector<8x128xf32> -> vector<8x128xf32>
    %110 = arith.addf %109, %99 : vector<8x128xf32>
    %111 = arith.addf %110, %12 : vector<8x128xf32>
    %112 = math.tanh %111 : vector<8x128xf32>
    %113 = arith.index_cast %c3_i32 : i32 to index
    %c0_77 = arith.constant 0 : index
    %c0_78 = arith.constant 0 : index
    %114 = vector.load %arg6[%113, %c0_77, %c0_78] : memref<8x8x128xf32, #tpu.memory_space<vmem>>, vector<1x8x128xf32>
    %115 = vector.shape_cast %114 : vector<1x8x128xf32> to vector<8x128xf32>
    %116 = vector.shape_cast %112 : vector<8x128xf32> to vector<1x8x128xf32>
    tpu.vector_store %arg6[%113, %c0_77, %c0_78], %116 {strides = array<i32>} : memref<8x8x128xf32, #tpu.memory_space<vmem>>, vector<1x8x128xf32>,
    %c4_i32 = arith.constant 4 : i32
    %117 = arith.truncf %105 : vector<8x128xf32> to vector<8x128xbf16>
    %c0_79 = arith.constant 0 : index
    %c0_80 = arith.constant 0 : index
    %c0_81 = arith.constant 0 : index
    %118 = vector.load %arg3[%c0_79, %c0_80, %c0_81] : memref<2x128x128xbf16, #tpu.memory_space<vmem>>, vector<1x128x128xbf16>
    %119 = vector.shape_cast %118 : vector<1x128x128xbf16> to vector<128x128xbf16>
    %cst_82 = arith.constant dense<0.000000e+00> : vector<8x128xf32>
    %120 = tpu.matmul %117, %119, %cst_82 {dimension_numbers = #tpu.dot_dimension_numbers<[1], [0], [0], [1], [0, 0, 1, 1], [], []>} : vector<8x128xbf16>, vector<128x128xbf16>, vector<8x128xf32> -> vector<8x128xf32>
    %121 = arith.truncf %112 : vector<8x128xf32> to vector<8x128xbf16>
    %c1_83 = arith.constant 1 : index
    %c0_84 = arith.constant 0 : index
    %c0_85 = arith.constant 0 : index
    %122 = vector.load %arg3[%c1_83, %c0_84, %c0_85] : memref<2x128x128xbf16, #tpu.memory_space<vmem>>, vector<1x128x128xbf16>
    %123 = vector.shape_cast %122 : vector<1x128x128xbf16> to vector<128x128xbf16>
    %cst_86 = arith.constant dense<0.000000e+00> : vector<8x128xf32>
    %124 = tpu.matmul %121, %123, %cst_86 {dimension_numbers = #tpu.dot_dimension_numbers<[1], [0], [0], [1], [0, 0, 1, 1], [], []>} : vector<8x128xbf16>, vector<128x128xbf16>, vector<8x128xf32> -> vector<8x128xf32>
    %c8_i32_87 = arith.constant 8 : i32
    %125 = arith.muli %c4_i32, %c8_i32_87 : i32
    %126 = tpu.assume_multiple %125, 8 : i32
    %127 = arith.index_cast %126 : i32 to index
    %c0_88 = arith.constant 0 : index
    %128 = vector.load %arg8[%127, %c0_88] : memref<64x128xf32, #tpu.memory_space<vmem>>, vector<8x128xf32>
    %129 = arith.addf %128, %120 : vector<8x128xf32>
    %130 = math.tanh %129 : vector<8x128xf32>
    %131 = arith.truncf %130 : vector<8x128xf32> to vector<8x128xbf16>
    %c0_89 = arith.constant 0 : index
    %c0_90 = arith.constant 0 : index
    %c0_91 = arith.constant 0 : index
    %132 = vector.load %arg4[%c0_89, %c0_90, %c0_91] : memref<1x128x128xbf16, #tpu.memory_space<vmem>>, vector<1x128x128xbf16>
    %133 = vector.shape_cast %132 : vector<1x128x128xbf16> to vector<128x128xbf16>
    %cst_92 = arith.constant dense<0.000000e+00> : vector<8x128xf32>
    %134 = tpu.matmul %131, %133, %cst_92 {dimension_numbers = #tpu.dot_dimension_numbers<[1], [0], [0], [1], [0, 0, 1, 1], [], []>} : vector<8x128xbf16>, vector<128x128xbf16>, vector<8x128xf32> -> vector<8x128xf32>
    %135 = arith.addf %134, %124 : vector<8x128xf32>
    %136 = arith.addf %135, %12 : vector<8x128xf32>
    %137 = math.tanh %136 : vector<8x128xf32>
    %138 = arith.index_cast %c4_i32 : i32 to index
    %c0_93 = arith.constant 0 : index
    %c0_94 = arith.constant 0 : index
    %139 = vector.load %arg6[%138, %c0_93, %c0_94] : memref<8x8x128xf32, #tpu.memory_space<vmem>>, vector<1x8x128xf32>
    %140 = vector.shape_cast %139 : vector<1x8x128xf32> to vector<8x128xf32>
    %141 = vector.shape_cast %137 : vector<8x128xf32> to vector<1x8x128xf32>
    tpu.vector_store %arg6[%138, %c0_93, %c0_94], %141 {strides = array<i32>} : memref<8x8x128xf32, #tpu.memory_space<vmem>>, vector<1x8x128xf32>,
    %c5_i32 = arith.constant 5 : i32
    %142 = arith.truncf %130 : vector<8x128xf32> to vector<8x128xbf16>
    %c0_95 = arith.constant 0 : index
    %c0_96 = arith.constant 0 : index
    %c0_97 = arith.constant 0 : index
    %143 = vector.load %arg3[%c0_95, %c0_96, %c0_97] : memref<2x128x128xbf16, #tpu.memory_space<vmem>>, vector<1x128x128xbf16>
    %144 = vector.shape_cast %143 : vector<1x128x128xbf16> to vector<128x128xbf16>
    %cst_98 = arith.constant dense<0.000000e+00> : vector<8x128xf32>
    %145 = tpu.matmul %142, %144, %cst_98 {dimension_numbers = #tpu.dot_dimension_numbers<[1], [0], [0], [1], [0, 0, 1, 1], [], []>} : vector<8x128xbf16>, vector<128x128xbf16>, vector<8x128xf32> -> vector<8x128xf32>
    %146 = arith.truncf %137 : vector<8x128xf32> to vector<8x128xbf16>
    %c1_99 = arith.constant 1 : index
    %c0_100 = arith.constant 0 : index
    %c0_101 = arith.constant 0 : index
    %147 = vector.load %arg3[%c1_99, %c0_100, %c0_101] : memref<2x128x128xbf16, #tpu.memory_space<vmem>>, vector<1x128x128xbf16>
    %148 = vector.shape_cast %147 : vector<1x128x128xbf16> to vector<128x128xbf16>
    %cst_102 = arith.constant dense<0.000000e+00> : vector<8x128xf32>
    %149 = tpu.matmul %146, %148, %cst_102 {dimension_numbers = #tpu.dot_dimension_numbers<[1], [0], [0], [1], [0, 0, 1, 1], [], []>} : vector<8x128xbf16>, vector<128x128xbf16>, vector<8x128xf32> -> vector<8x128xf32>
    %c8_i32_103 = arith.constant 8 : i32
    %150 = arith.muli %c5_i32, %c8_i32_103 : i32
    %151 = tpu.assume_multiple %150, 8 : i32
    %152 = arith.index_cast %151 : i32 to index
    %c0_104 = arith.constant 0 : index
    %153 = vector.load %arg8[%152, %c0_104] : memref<64x128xf32, #tpu.memory_space<vmem>>, vector<8x128xf32>
    %154 = arith.addf %153, %145 : vector<8x128xf32>
    %155 = math.tanh %154 : vector<8x128xf32>
    %156 = arith.truncf %155 : vector<8x128xf32> to vector<8x128xbf16>
    %c0_105 = arith.constant 0 : index
    %c0_106 = arith.constant 0 : index
    %c0_107 = arith.constant 0 : index
    %157 = vector.load %arg4[%c0_105, %c0_106, %c0_107] : memref<1x128x128xbf16, #tpu.memory_space<vmem>>, vector<1x128x128xbf16>
    %158 = vector.shape_cast %157 : vector<1x128x128xbf16> to vector<128x128xbf16>
    %cst_108 = arith.constant dense<0.000000e+00> : vector<8x128xf32>
    %159 = tpu.matmul %156, %158, %cst_108 {dimension_numbers = #tpu.dot_dimension_numbers<[1], [0], [0], [1], [0, 0, 1, 1], [], []>} : vector<8x128xbf16>, vector<128x128xbf16>, vector<8x128xf32> -> vector<8x128xf32>
    %160 = arith.addf %159, %149 : vector<8x128xf32>
    %161 = arith.addf %160, %12 : vector<8x128xf32>
    %162 = math.tanh %161 : vector<8x128xf32>
    %163 = arith.index_cast %c5_i32 : i32 to index
    %c0_109 = arith.constant 0 : index
    %c0_110 = arith.constant 0 : index
    %164 = vector.load %arg6[%163, %c0_109, %c0_110] : memref<8x8x128xf32, #tpu.memory_space<vmem>>, vector<1x8x128xf32>
    %165 = vector.shape_cast %164 : vector<1x8x128xf32> to vector<8x128xf32>
    %166 = vector.shape_cast %162 : vector<8x128xf32> to vector<1x8x128xf32>
    tpu.vector_store %arg6[%163, %c0_109, %c0_110], %166 {strides = array<i32>} : memref<8x8x128xf32, #tpu.memory_space<vmem>>, vector<1x8x128xf32>,
    %c6_i32 = arith.constant 6 : i32
    %167 = arith.truncf %155 : vector<8x128xf32> to vector<8x128xbf16>
    %c0_111 = arith.constant 0 : index
    %c0_112 = arith.constant 0 : index
    %c0_113 = arith.constant 0 : index
    %168 = vector.load %arg3[%c0_111, %c0_112, %c0_113] : memref<2x128x128xbf16, #tpu.memory_space<vmem>>, vector<1x128x128xbf16>
    %169 = vector.shape_cast %168 : vector<1x128x128xbf16> to vector<128x128xbf16>
    %cst_114 = arith.constant dense<0.000000e+00> : vector<8x128xf32>
    %170 = tpu.matmul %167, %169, %cst_114 {dimension_numbers = #tpu.dot_dimension_numbers<[1], [0], [0], [1], [0, 0, 1, 1], [], []>} : vector<8x128xbf16>, vector<128x128xbf16>, vector<8x128xf32> -> vector<8x128xf32>
    %171 = arith.truncf %162 : vector<8x128xf32> to vector<8x128xbf16>
    %c1_115 = arith.constant 1 : index
    %c0_116 = arith.constant 0 : index
    %c0_117 = arith.constant 0 : index
    %172 = vector.load %arg3[%c1_115, %c0_116, %c0_117] : memref<2x128x128xbf16, #tpu.memory_space<vmem>>, vector<1x128x128xbf16>
    %173 = vector.shape_cast %172 : vector<1x128x128xbf16> to vector<128x128xbf16>
    %cst_118 = arith.constant dense<0.000000e+00> : vector<8x128xf32>
    %174 = tpu.matmul %171, %173, %cst_118 {dimension_numbers = #tpu.dot_dimension_numbers<[1], [0], [0], [1], [0, 0, 1, 1], [], []>} : vector<8x128xbf16>, vector<128x128xbf16>, vector<8x128xf32> -> vector<8x128xf32>
    %c8_i32_119 = arith.constant 8 : i32
    %175 = arith.muli %c6_i32, %c8_i32_119 : i32
    %176 = tpu.assume_multiple %175, 8 : i32
    %177 = arith.index_cast %176 : i32 to index
    %c0_120 = arith.constant 0 : index
    %178 = vector.load %arg8[%177, %c0_120] : memref<64x128xf32, #tpu.memory_space<vmem>>, vector<8x128xf32>
    %179 = arith.addf %178, %170 : vector<8x128xf32>
    %180 = math.tanh %179 : vector<8x128xf32>
    %181 = arith.truncf %180 : vector<8x128xf32> to vector<8x128xbf16>
    %c0_121 = arith.constant 0 : index
    %c0_122 = arith.constant 0 : index
    %c0_123 = arith.constant 0 : index
    %182 = vector.load %arg4[%c0_121, %c0_122, %c0_123] : memref<1x128x128xbf16, #tpu.memory_space<vmem>>, vector<1x128x128xbf16>
    %183 = vector.shape_cast %182 : vector<1x128x128xbf16> to vector<128x128xbf16>
    %cst_124 = arith.constant dense<0.000000e+00> : vector<8x128xf32>
    %184 = tpu.matmul %181, %183, %cst_124 {dimension_numbers = #tpu.dot_dimension_numbers<[1], [0], [0], [1], [0, 0, 1, 1], [], []>} : vector<8x128xbf16>, vector<128x128xbf16>, vector<8x128xf32> -> vector<8x128xf32>
    %185 = arith.addf %184, %174 : vector<8x128xf32>
    %186 = arith.addf %185, %12 : vector<8x128xf32>
    %187 = math.tanh %186 : vector<8x128xf32>
    %188 = arith.index_cast %c6_i32 : i32 to index
    %c0_125 = arith.constant 0 : index
    %c0_126 = arith.constant 0 : index
    %189 = vector.load %arg6[%188, %c0_125, %c0_126] : memref<8x8x128xf32, #tpu.memory_space<vmem>>, vector<1x8x128xf32>
    %190 = vector.shape_cast %189 : vector<1x8x128xf32> to vector<8x128xf32>
    %191 = vector.shape_cast %187 : vector<8x128xf32> to vector<1x8x128xf32>
    tpu.vector_store %arg6[%188, %c0_125, %c0_126], %191 {strides = array<i32>} : memref<8x8x128xf32, #tpu.memory_space<vmem>>, vector<1x8x128xf32>,
    %c7_i32 = arith.constant 7 : i32
    %192 = arith.truncf %180 : vector<8x128xf32> to vector<8x128xbf16>
    %c0_127 = arith.constant 0 : index
    %c0_128 = arith.constant 0 : index
    %c0_129 = arith.constant 0 : index
    %193 = vector.load %arg3[%c0_127, %c0_128, %c0_129] : memref<2x128x128xbf16, #tpu.memory_space<vmem>>, vector<1x128x128xbf16>
    %194 = vector.shape_cast %193 : vector<1x128x128xbf16> to vector<128x128xbf16>
    %cst_130 = arith.constant dense<0.000000e+00> : vector<8x128xf32>
    %195 = tpu.matmul %192, %194, %cst_130 {dimension_numbers = #tpu.dot_dimension_numbers<[1], [0], [0], [1], [0, 0, 1, 1], [], []>} : vector<8x128xbf16>, vector<128x128xbf16>, vector<8x128xf32> -> vector<8x128xf32>
    %196 = arith.truncf %187 : vector<8x128xf32> to vector<8x128xbf16>
    %c1_131 = arith.constant 1 : index
    %c0_132 = arith.constant 0 : index
    %c0_133 = arith.constant 0 : index
    %197 = vector.load %arg3[%c1_131, %c0_132, %c0_133] : memref<2x128x128xbf16, #tpu.memory_space<vmem>>, vector<1x128x128xbf16>
    %198 = vector.shape_cast %197 : vector<1x128x128xbf16> to vector<128x128xbf16>
    %cst_134 = arith.constant dense<0.000000e+00> : vector<8x128xf32>
    %199 = tpu.matmul %196, %198, %cst_134 {dimension_numbers = #tpu.dot_dimension_numbers<[1], [0], [0], [1], [0, 0, 1, 1], [], []>} : vector<8x128xbf16>, vector<128x128xbf16>, vector<8x128xf32> -> vector<8x128xf32>
    %c8_i32_135 = arith.constant 8 : i32
    %200 = arith.muli %c7_i32, %c8_i32_135 : i32
    %201 = tpu.assume_multiple %200, 8 : i32
    %202 = arith.index_cast %201 : i32 to index
    %c0_136 = arith.constant 0 : index
    %203 = vector.load %arg8[%202, %c0_136] : memref<64x128xf32, #tpu.memory_space<vmem>>, vector<8x128xf32>
    %204 = arith.addf %203, %195 : vector<8x128xf32>
    %205 = math.tanh %204 : vector<8x128xf32>
    %206 = arith.truncf %205 : vector<8x128xf32> to vector<8x128xbf16>
    %c0_137 = arith.constant 0 : index
    %c0_138 = arith.constant 0 : index
    %c0_139 = arith.constant 0 : index
    %207 = vector.load %arg4[%c0_137, %c0_138, %c0_139] : memref<1x128x128xbf16, #tpu.memory_space<vmem>>, vector<1x128x128xbf16>
    %208 = vector.shape_cast %207 : vector<1x128x128xbf16> to vector<128x128xbf16>
    %cst_140 = arith.constant dense<0.000000e+00> : vector<8x128xf32>
    %209 = tpu.matmul %206, %208, %cst_140 {dimension_numbers = #tpu.dot_dimension_numbers<[1], [0], [0], [1], [0, 0, 1, 1], [], []>} : vector<8x128xbf16>, vector<128x128xbf16>, vector<8x128xf32> -> vector<8x128xf32>
    %210 = arith.addf %209, %199 : vector<8x128xf32>
    %211 = arith.addf %210, %12 : vector<8x128xf32>
    %212 = math.tanh %211 : vector<8x128xf32>
    %213 = arith.index_cast %c7_i32 : i32 to index
    %c0_141 = arith.constant 0 : index
    %c0_142 = arith.constant 0 : index
    %214 = vector.load %arg6[%213, %c0_141, %c0_142] : memref<8x8x128xf32, #tpu.memory_space<vmem>>, vector<1x8x128xf32>
    %215 = vector.shape_cast %214 : vector<1x8x128xf32> to vector<8x128xf32>
    %216 = vector.shape_cast %212 : vector<8x128xf32> to vector<1x8x128xf32>
    tpu.vector_store %arg6[%213, %c0_141, %c0_142], %216 {strides = array<i32>} : memref<8x8x128xf32, #tpu.memory_space<vmem>>, vector<1x8x128xf32>,
    %c8_i32_143 = arith.constant 8 : i32
    %c0_144 = arith.constant 0 : index
    %c0_145 = arith.constant 0 : index
    %c0_146 = arith.constant 0 : index
    %217 = vector.load %arg7[%c0_144, %c0_145, %c0_146] : memref<2x8x128xf32, #tpu.memory_space<vmem>>, vector<1x8x128xf32>
    %218 = vector.shape_cast %217 : vector<1x8x128xf32> to vector<8x128xf32>
    %219 = vector.shape_cast %205 : vector<8x128xf32> to vector<1x8x128xf32>
    tpu.vector_store %arg7[%c0_144, %c0_145, %c0_146], %219 {strides = array<i32>} : memref<2x8x128xf32, #tpu.memory_space<vmem>>, vector<1x8x128xf32>,
    %c1_147 = arith.constant 1 : index
    %c0_148 = arith.constant 0 : index
    %c0_149 = arith.constant 0 : index
    %220 = vector.load %arg7[%c1_147, %c0_148, %c0_149] : memref<2x8x128xf32, #tpu.memory_space<vmem>>, vector<1x8x128xf32>
    %221 = vector.shape_cast %220 : vector<1x8x128xf32> to vector<8x128xf32>
    %222 = vector.shape_cast %212 : vector<8x128xf32> to vector<1x8x128xf32>
    tpu.vector_store %arg7[%c1_147, %c0_148, %c0_149], %222 {strides = array<i32>} : memref<2x8x128xf32, #tpu.memory_space<vmem>>, vector<1x8x128xf32>,
    return
  }
  func.func @transform_0(%arg0: i32) -> (i32, i32) {
    %c0_i32 = arith.constant 0 : i32
    %c0_i32_0 = arith.constant 0 : i32
    return %arg0, %c0_i32 : i32, i32
  }
  func.func @transform_1(%arg0: i32) -> (i32, i32) {
    %c0_i32 = arith.constant 0 : i32
    %c0_i32_0 = arith.constant 0 : i32
    %c0_i32_1 = arith.constant 0 : i32
    return %c0_i32, %c0_i32_0 : i32, i32
  }
  func.func @transform_2(%arg0: i32) -> (i32, i32, i32) {
    %c0_i32 = arith.constant 0 : i32
    %c0_i32_0 = arith.constant 0 : i32
    %c0_i32_1 = arith.constant 0 : i32
    %c0_i32_2 = arith.constant 0 : i32
    return %c0_i32, %c0_i32_0, %c0_i32_1 : i32, i32, i32
  }
  func.func @transform_3(%arg0: i32) -> (i32, i32, i32) {
    %c0_i32 = arith.constant 0 : i32
    %c0_i32_0 = arith.constant 0 : i32
    %c0_i32_1 = arith.constant 0 : i32
    %c0_i32_2 = arith.constant 0 : i32
    return %c0_i32, %c0_i32_0, %c0_i32_1 : i32, i32, i32
  }
  func.func @transform_4(%arg0: i32) -> (i32, i32) {
    %c0_i32 = arith.constant 0 : i32
    %c0_i32_0 = arith.constant 0 : i32
    %c0_i32_1 = arith.constant 0 : i32
    return %c0_i32, %c0_i32_0 : i32, i32
  }
  func.func @transform_5(%arg0: i32) -> (i32, i32, i32) {
    %c0_i32 = arith.constant 0 : i32
    %c0_i32_0 = arith.constant 0 : i32
    %c0_i32_1 = arith.constant 0 : i32
    return %arg0, %c0_i32, %c0_i32_0 : i32, i32, i32
  }
}

</mosaic_0001>

<bundles_post_ra>
// kernel: tpu_custom_call.1
= control target key start
LH: loop header
LB: loop body
LE: loop exit
PB: predicated region body
PF: predicated region fallthrough
CT: control target
= control target key end

     0   :  { %10 = vsyncpa [#allocation5], 0  ;;  %s4353_s0 = inlined_call_operand.vmem [shape: bf16[64,16], index: 0, kind: input, shape index: {}]   ;;  %s4354_s1 = inlined_call_operand.vmem [shape: bf16[16,128], index: 1, kind: input, shape index: {}]   ;;  %s4355_s2 = inlined_call_operand.hbm [shape: bf16[2,128,128], index: 2, kind: input, shape index: {}]   ;;  %s4356_s3 = inlined_call_operand.hbm [shape: bf16[1,128,128], index: 3, kind: input, shape index: {}]   ;;  %s4357_s4 = inlined_call_operand.vmem [shape: f32[2,128], index: 4, kind: input, shape index: {}]   ;;  %s4358_s5 = inlined_call_operand.hbm [shape: f32[8,8,128], index: 5, kind: output, shape index: {}]  }
   0x1   :  { %11 = vsyncpa [#allocation8], 0 }
   0x2   :  { %12 = vsyncpa [#allocation6], 0  ;;  %s4007_s18 = smov [#allocation4]  }
   0x3   :  { %s22_s19 = sshll.u32 %s4007_s18, 4  ;;  %s23_s19 = int_to_ptr.vmem [resolvable:$true] %s22_s19 }
   0x4   :  { %s3949_s20 = scalar_lea.vmem %s23_s19, 2048  ;;  %p3954_p1 = scmp.lt.s32.totalorder %s23_s19, %s23_s19 }
   0x5   :  { %p3950_p0 = scmp.ne.s32.totalorder %s23_s19, %s3949_s20  ;;  %p3955_p2 = scmp.lt.s32.totalorder %s3949_s20, %s3949_s20 }
   0x7   :  { %p3956_p3 = por %p3955_p2, %p3954_p1 }
   0x9   :  { %p3957_p4 = pnand %p3956_p3, %p3950_p0 }
   0xb   :  { %3960 = shalt.err (!%p3957_p4)
}
   0xc   :  { %s4008_s21 = smov 64   ;;  %s4009_s22 = smov 4  }
   0xd   :  { %28 = dma.hbm_to_vmem [thread:$0]  %s4355_s2, 2048, %s23_s19, [#allocation5], %s4008_s21, %s4008_s21, %s4009_s22  }
   0xe   :  { %s4010_s25 = smov [#allocation7]  }
   0xf   :  { %s34_s26 = sshll.u32 %s4010_s25, 4  ;;  %s35_s26 = int_to_ptr.vmem [resolvable:$true] %s34_s26 }
  0x10   :  { %s3969_s27 = scalar_lea.vmem %s35_s26, 1024  ;;  %p3974_p6 = scmp.lt.s32.totalorder %s35_s26, %s35_s26 }
  0x11   :  { %p3970_p5 = scmp.ne.s32.totalorder %s35_s26, %s3969_s27  ;;  %p3975_p7 = scmp.lt.s32.totalorder %s3969_s27, %s3969_s27 }
  0x13   :  { %p3976_p8 = por %p3975_p7, %p3974_p6 }
  0x15   :  { %p3977_p9 = pnand %p3976_p8, %p3970_p5 }
  0x17   :  { %3980 = shalt.err (!%p3977_p9)
}
  0x18   :  { %40 = dma.hbm_to_vmem [thread:$0]  %s4356_s3, 1024, %s35_s26, [#allocation8], %s4008_s21, %s4008_s21, %s4009_s22  }
  0x19   :  { %4001 = dma.done.wait [#allocation5], 2048  }
  0x1a   :  { %4002 = vsyncadd [#allocation5], 4294965248 }
  0x1b   :  { %4003 = dma.done.wait [#allocation8], 1024  }
  0x1c   :  { %4004 = vsyncadd [#allocation8], 4294966272  ;;  %v4011_v0 = vmov 0.0   ;;  %vm4012_vm0 = vmmov 0   ;;  %v3711_v1 = vld [vmem:[#allocation4 + $0x38] sm:$0xff]   ;;  %v3712_v2 = vld [vmem:[#allocation4 + $0x30] sm:$0xff]  }
  0x1d   :  { %3221 = vmatprep.subr.bf16.mxu1 %v4011_v0  ;;  %3237 = vmatprep.mubr.msk.bf16.mxu1 %vm4012_vm0, %v4011_v0  ;;  %v3713_v3 = vld [vmem:[#allocation4 + $0x28] sm:$0xff]   ;;  %v3716_v4 = vld [vmem:[%s4354_s1] sm:$0xff]   ;;  %vm97_vm1 = vcmask 130048   ;;  %v3722_v8 = vld [vmem:[#allocation4 + $0x78] sm:$0xff]   ;;  %v4013_v22 = vmov 0.0|0.0  }
  0x1e   :  { %3222 = vmatpush3.bf16.msra.mxu1 %v3711_v1  ;;  %v3717_v5 = vld [vmem:[%s4353_s0] sm:$0xff]   ;;  %3211 = vmatprep.subr.bf16.mxu0 %v3716_v4  ;;  %v3719_v6 = vld [vmem:[%s4353_s0 + $0x8] sm:$0xff]   ;;  %v3723_v9 = vld [vmem:[#allocation4 + $0x70] sm:$0xff]  }
  0x1f   :  { %3223 = vmatprep.subr.bf16.mxu1 %v4011_v0  ;;  %3212 = vmatpush3.bf16.msra.mxu0 %v3716_v4  ;;  %v3714_v7 = vld [vmem:[#allocation4 + $0x20] sm:$0xff]   ;;  %v3715_v10 = vld [vmem:[#allocation4 + $0x18] sm:$0xff]   ;;  %v3718_v11 = vld [vmem:[#allocation4 + $0x10] sm:$0xff]  }
  0x20   :  { %3213 = vmatprep.mubr.msk.bf16.mxu0 %vm97_vm1, %v3717_v5  ;;  %3241 = vmatprep.subr.bf16.mxu0 %v4011_v0  ;;  %v3724_v12 = vld [vmem:[#allocation4 + $0x68] sm:$0xff]   ;;  %v3728_v13 = vld [vmem:[%s4353_s0 + $0x10] sm:$0xff]   ;;  %v3729_v14 = vld [vmem:[%s4353_s0 + $0x18] sm:$0xff]  }
  0x21   :  { %v3725_v15 = vld [vmem:[#allocation4 + $0x60] sm:$0xff]   ;;  %v3720_v16 = vld [vmem:[#allocation4 + $0x8] sm:$0xff]   ;;  %v3726_v17 = vld [vmem:[#allocation4 + $0x58] sm:$0xff]  }
  0x22   :  { %3224 = vmatpush3.bf16.msra.mxu1 %v3712_v2  ;;  %3214 = vmatmul.mubr.msk.bf16.vlgmr.msra.gmra.mxu0 %vm97_vm1, %v3719_v6  ;;  %v3721_v18 = vld [vmem:[#allocation4] sm:$0xff]   ;;  %v3727_v19 = vld [vmem:[#allocation4 + $0x50] sm:$0xff]   ;;  %v3732_v20 = vld [vmem:[#allocation7 + $0x38] sm:$0xff]  }
  0x23   :  { %3225 = vmatprep.subr.bf16.mxu1 %v4011_v0  ;;  %3242 = vmatpush3.bf16.msra.mxu0 %v3722_v8  ;;  %v3730_v21 = vld [vmem:[#allocation4 + $0x48] sm:$0xff]   ;;  %v3731_v23 = vld [vmem:[#allocation4 + $0x40] sm:$0xff]   ;;  %v3733_v24 = vld [vmem:[#allocation4 + $0x38] sm:$0xff]  }
  0x24   :  { %3243 = vmatprep.subr.bf16.mxu0 %v4011_v0  ;;  %3217 = vmatprep.mubr.msk.bf16.mxu0 %vm97_vm1, %v3728_v13  ;;  %v3734_v25 = vld [vmem:[#allocation7 + $0x30] sm:$0xff]   ;;  %v3736_v27 = vld [vmem:[#allocation7 + $0x28] sm:$0xff]   ;;  %v3738_v29 = vld [vmem:[#allocation7 + $0x20] sm:$0xff]  }
  0x25   :  { %v3735_v26 = vld [vmem:[#allocation4 + $0x30] sm:$0xff]   ;;  %v3737_v28 = vld [vmem:[#allocation4 + $0x28] sm:$0xff]   ;;  %v3739_v30 = vld [vmem:[#allocation4 + $0x20] sm:$0xff]  }
  0x26   :  { %3226 = vmatpush3.bf16.msra.mxu1 %v3713_v3  ;;  %v3740_v31 = vld [vmem:[#allocation7 + $0x18] sm:$0xff]   ;;  %v3742_v33 = vld [vmem:[#allocation7 + $0x10] sm:$0xff]   ;;  %v3744_v35 = vld [vmem:[#allocation7 + $0x8] sm:$0xff]  }
  0x27   :  { %3227 = vmatprep.subr.bf16.mxu1 %v4011_v0  ;;  %3244 = vmatpush3.bf16.msra.mxu0 %v3723_v9  ;;  %v3741_v32 = vld [vmem:[#allocation4 + $0x18] sm:$0xff]   ;;  %v3743_v34 = vld [vmem:[#allocation4 + $0x10] sm:$0xff]   ;;  %v3745_v36 = vld [vmem:[#allocation4 + $0x8] sm:$0xff]  }
  0x28   :  { %3245 = vmatprep.subr.bf16.mxu0 %v4011_v0  ;;  %v3746_v37 = vld [vmem:[#allocation7] sm:$0xff]   ;;  %v3748_v2 = vld [vmem:[#allocation7 + $0x38] sm:$0xff]   ;;  %v3750_v6 = vld [vmem:[#allocation7 + $0x30] sm:$0xff]  }
  0x29   :  { %v3747_v38 = vld [vmem:[#allocation4] sm:$0xff]   ;;  %v3749_v3 = vld [vmem:[#allocation4 + $0x78] sm:$0xff]   ;;  %v3752_v8 = vld [vmem:[#allocation7 + $0x28] sm:$0xff]  }
  0x2a   :  { %3228 = vmatpush3.bf16.msra.mxu1 %v3714_v7  ;;  %3218 = vmatmul.mubr.msk.bf16.gmra.mxu0 %vm97_vm1, %v3729_v14  ;;  %v2787_v39 = vld [vmem:[%s4357_s4] ss:$0 sm:$0xff]  ;;  %v3751_v7 = vld [vmem:[#allocation4 + $0x70] sm:$0xff]   ;;  %v3753_v9 = vld [vmem:[#allocation4 + $0x68] sm:$0xff]  }
  0x2b   :  { %3229 = vmatprep.subr.bf16.mxu1 %v4011_v0  ;;  %3246 = vmatpush3.bf16.msra.mxu0 %v3724_v12  ;;  %v3756_v12 = vld [vmem:[#allocation7 + $0x18] sm:$0xff]   ;;  %v3758_v14 = vld [vmem:[#allocation7 + $0x10] sm:$0xff]  }
  0x2c   :  { %3257 = vmatprep.mubr.msk.bf16.mxu0 %vm4012_vm0, %v4011_v0  ;;  %3247 = vmatprep.subr.bf16.mxu0 %v4011_v0  ;;  %v3757_v13 = vld [vmem:[#allocation4 + $0x58] sm:$0xff]  }
  0x2e   :  { %3230 = vmatpush3.bf16.msra.mxu1 %v3715_v10  ;;  %v3754_v10 = vld [vmem:[#allocation7 + $0x20] sm:$0xff]  }
  0x2f   :  { %3231 = vmatprep.subr.bf16.mxu1 %v4011_v0  ;;  %3248 = vmatpush3.bf16.msra.mxu0 %v3725_v15  ;;  %v3759_v15 = vld [vmem:[#allocation4 + $0x50] sm:$0xff]  }
  0x30   :  { %3249 = vmatprep.subr.bf16.mxu0 %v4011_v0 }
  0x32   :  { %3232 = vmatpush3.bf16.msra.mxu1 %v3718_v11  ;;  %v3755_v11 = vld [vmem:[#allocation4 + $0x60] sm:$0xff]  }
  0x33   :  { %3233 = vmatprep.subr.bf16.mxu1 %v4011_v0  ;;  %3250 = vmatpush3.bf16.msra.mxu0 %v3726_v17  ;;  %v3761_v17 = vld [vmem:[#allocation4 + $0x48] sm:$0xff]  }
  0x34   :  { %3251 = vmatprep.subr.bf16.mxu0 %v4011_v0 }
  0x36   :  { %3234 = vmatpush3.bf16.msra.mxu1 %v3720_v16  ;;  %v3760_v16 = vld [vmem:[#allocation7 + $0x8] sm:$0xff]  }
  0x37   :  { %3235 = vmatprep.subr.bf16.mxu1 %v4011_v0  ;;  %3252 = vmatpush3.bf16.msra.mxu0 %v3727_v19  ;;  %v3763_v19 = vld [vmem:[#allocation4 + $0x40] sm:$0xff]  }
  0x38   :  { %3253 = vmatprep.subr.bf16.mxu0 %v4011_v0 }
  0x3a   :  { %3236 = vmatpush3.bf16.msra.mxu1 %v3721_v18  ;;  %v3762_v18 = vld [vmem:[#allocation7] sm:$0xff]  }
  0x3b   :  { %3261 = vmatprep.subr.bf16.mxu1 %v4011_v0  ;;  %3254 = vmatpush3.bf16.msra.mxu0 %v3730_v21 }
  0x3c   :  { %3255 = vmatprep.subr.bf16.mxu0 %v4011_v0 }
  0x3d   :  { %3238 = vmatmul.mubr.bf16.vlgmr.msra.gmra.mxu1 %v4013_v22 }
  0x3e   :  { %3262 = vmatpush3.bf16.msra.mxu1 %v3732_v20  ;;  %3277 = vmatprep.mubr.msk.bf16.mxu1 %vm4012_vm0, %v4011_v0  ;;  %v4154_v20 = vld [vmem:[%s4357_s4 + $0x1] ss:$0 sm:$0xff] }
  0x3f   :  { %3263 = vmatprep.subr.bf16.mxu1 %v4011_v0  ;;  %3256 = vmatpush3.bf16.msra.mxu0 %v3731_v23 }
  0x40   :  { %3281 = vmatprep.subr.bf16.mxu0 %v4011_v0 }
  0x42   :  { %3258 = vmatmul.mubr.bf16.vlgmr.msra.gmra.mxu0 %v4013_v22  ;;  %3264 = vmatpush3.bf16.msra.mxu1 %v3734_v25 }
  0x43   :  { %3282 = vmatpush3.bf16.msra.mxu0 %v3733_v24  ;;  %3297 = vmatprep.mubr.msk.bf16.mxu0 %vm4012_vm0, %v4011_v0 }
  0x44   :  { %3283 = vmatprep.subr.bf16.mxu0 %v4011_v0  ;;  %3265 = vmatprep.subr.bf16.mxu1 %v4011_v0 }
  0x46   :  { %3266 = vmatpush3.bf16.msra.mxu1 %v3736_v27 }
  0x47   :  { %3284 = vmatpush3.bf16.msra.mxu0 %v3735_v26  ;;  %3267 = vmatprep.subr.bf16.mxu1 %v4011_v0 }
  0x48   :  { %3285 = vmatprep.subr.bf16.mxu0 %v4011_v0 }
  0x4a   :  { %3268 = vmatpush3.bf16.msra.mxu1 %v3738_v29 }
  0x4b   :  { %3286 = vmatpush3.bf16.msra.mxu0 %v3737_v28  ;;  %3269 = vmatprep.subr.bf16.mxu1 %v4011_v0 }
  0x4c   :  { %3287 = vmatprep.subr.bf16.mxu0 %v4011_v0 }
  0x4e   :  { %3270 = vmatpush3.bf16.msra.mxu1 %v3740_v31 }
  0x4f   :  { %3288 = vmatpush3.bf16.msra.mxu0 %v3739_v30  ;;  %3271 = vmatprep.subr.bf16.mxu1 %v4011_v0 }
  0x50   :  { %3289 = vmatprep.subr.bf16.mxu0 %v4011_v0 }
  0x52   :  { %3272 = vmatpush3.bf16.msra.mxu1 %v3742_v33  ;;  %v3772_v33 = vld [vmem:[#allocation4 + $0x78] sm:$0xff]  }
  0x53   :  { %3290 = vmatpush3.bf16.msra.mxu0 %v3741_v32  ;;  %3273 = vmatprep.subr.bf16.mxu1 %v4011_v0 }
  0x54   :  { %3291 = vmatprep.subr.bf16.mxu0 %v4011_v0 }
  0x56   :  { %3274 = vmatpush3.bf16.msra.mxu1 %v3744_v35 }
  0x57   :  { %3292 = vmatpush3.bf16.msra.mxu0 %v3743_v34  ;;  %3275 = vmatprep.subr.bf16.mxu1 %v4011_v0 }
  0x58   :  { %3293 = vmatprep.subr.bf16.mxu0 %v4011_v0 }
  0x5a   :  { %3276 = vmatpush3.bf16.msra.mxu1 %v3746_v37 }
  0x5b   :  { %3294 = vmatpush3.bf16.msra.mxu0 %v3745_v36  ;;  %3301 = vmatprep.subr.bf16.mxu1 %v4011_v0  ;;  %v3764_v36 = vld [vmem:[#allocation4 + $0x38] sm:$0xff]  }
  0x5c   :  { %3295 = vmatprep.subr.bf16.mxu0 %v4011_v0 }
  0x5f   :  { %3296 = vmatpush3.bf16.msra.mxu0 %v3747_v38  ;;  %v3773_v38 = vld [vmem:[#allocation4 + $0x70] sm:$0xff]  }
  0x60   :  { %3321 = vmatprep.subr.bf16.mxu0 %v4011_v0 }
  0xe2   :  { %v3215_v40 = vpop.f32.mrf.mxu0 }
  0xe3   :  { %v4117_v41 = vadd.f32 %v3215_v40, %v2787_v39  ;;  %v3774_v40 = vld [vmem:[#allocation4 + $0x68] sm:$0xff]  }
  0xe4   :  { %v144_v42 = vpop.f32.mrf.mxu0 }
  0xe5   :  { %v145_v55 = vadd.f32 %v2787_v39, %v144_v42  ;;  %v3766_v42 = vld [vmem:[#allocation4 + $0x28] sm:$0xff]  }
  0xe6   :  { %v3216_v43 = vpop.f32.mrf.mxu0 }
  0xe7   :  { %v4119_v44 = vadd.f32 %v3216_v43, %v2787_v39  ;;  %v3767_v43 = vld [vmem:[#allocation4 + $0x20] sm:$0xff]  }
  0xe8   :  { %v147_v45 = vpop.f32.mrf.mxu0 }
  0xe9   :  { %v4121_v46 = vadd.f32 %v2787_v39, %v147_v45  ;;  %v3768_v45 = vld [vmem:[#allocation4 + $0x18] sm:$0xff]  }
  0xea   :  { %v3219_v47 = vpop.f32.mrf.mxu0 }
  0xeb   :  { %v4123_v48 = vadd.f32 %v3219_v47, %v2787_v39  ;;  %v3770_v47 = vld [vmem:[#allocation4 + $0x8] sm:$0xff]  }
  0xec   :  { %v160_v49 = vpop.f32.mrf.mxu0 }
  0xed   :  { %v4125_v50 = vadd.f32 %v2787_v39, %v160_v49  ;;  %v3771_v49 = vld [vmem:[#allocation4] sm:$0xff]  }
  0xee   :  { %v3220_v51 = vpop.f32.mrf.mxu0 }
  0xef   :  { %v4127_v52 = vadd.f32 %v3220_v51, %v2787_v39  ;;  %v3775_v51 = vld [vmem:[#allocation4 + $0x60] sm:$0xff]  }
  0xf0   :  { %v163_v53 = vpop.f32.mrf.mxu0 }
  0xf1   :  { %v4129_v54 = vadd.f32 %v2787_v39, %v163_v53  ;;  %v3765_v39 = vld [vmem:[#allocation4 + $0x30] sm:$0xff]   ;;  %v3776_v53 = vld [vmem:[#allocation4 + $0x58] sm:$0xff]  }
  0xfd   :  { %v290_v56 = vpop.f32.mrf.mxu1 }
  0xfe   :  { %v403_v57 = vadd.f32 %v290_v56, %v145_v55  ;;  %v3777_v55 = vld [vmem:[#allocation4 + $0x50] sm:$0xff]   ;;  %v3778_v56 = vld [vmem:[#allocation4 + $0x48] sm:$0xff]  }
  0xff   :  { %v3239_v58 = vpop.f32.mrf.mxu1 }
 0x100   :  { %3908 = vtanh.f32 %v403_v57  ;;  %v3779_v57 = vld [vmem:[#allocation4 + $0x40] sm:$0xff]   ;;  %v3780_v58 = vld [vmem:[#allocation7 + $0x38] sm:$0xff]  }
 0x101   :  { %v293_v59 = vpop.f32.mrf.mxu1 }
 0x102   :  { %v396_v61 = vpop.f32.mrf.mxu0  ;;  %v3782_v59 = vld [vmem:[#allocation7 + $0x30] sm:$0xff]  }
 0x103   :  { %v3240_v60 = vpop.f32.mrf.mxu1 }
 0x104   :  { %v3259_v62 = vpop.f32.mrf.mxu0  ;;  %v3784_v60 = vld [vmem:[#allocation7 + $0x28] sm:$0xff]  }
 0x105   :  { %v3788_v62 = vld [vmem:[#allocation7 + $0x18] sm:$0xff]  }
 0x106   :  { %v399_v63 = vpop.f32.mrf.mxu0 }
 0x107   :  { %v3790_v63 = vld [vmem:[#allocation7 + $0x10] sm:$0xff]  }
 0x108   :  { %v3260_v5 = vpop.f32.mrf.mxu0 }
 0x10d   :  { %v3909_v1 = vpop.eup %3908 }
 0x10e   :  { %v405_v4 = vpack.c.bf16 %v3909_v1, %v3909_v1  ;;  %v3792_v1 = vld [vmem:[#allocation7 + $0x8] sm:$0xff]  }
 0x110   :  { %3278 = vmatmul.mubr.bf16.vlgmr.msra.gmra.mxu1 %v405_v4  ;;  %3298 = vmatmul.mubr.bf16.vlgmr.msra.gmra.mxu0 %v405_v4 }
 0x111   :  { %3322 = vmatpush3.bf16.msra.mxu0 %v3748_v2  ;;  %3302 = vmatpush3.bf16.msra.mxu1 %v3749_v3  ;;  %v3794_v2 = vld [vmem:[#allocation7] sm:$0xff]  }
 0x112   :  { %3323 = vmatprep.subr.bf16.mxu0 %v4011_v0  ;;  %3303 = vmatprep.subr.bf16.mxu1 %v4011_v0 }
 0x113   :  { %3337 = vmatprep.mubr.msk.bf16.mxu0 %vm4012_vm0, %v4011_v0  ;;  %3317 = vmatprep.mubr.msk.bf16.mxu1 %vm4012_vm0, %v4011_v0 }
 0x115   :  { %3324 = vmatpush3.bf16.msra.mxu0 %v3750_v6  ;;  %3304 = vmatpush3.bf16.msra.mxu1 %v3751_v7 }
 0x116   :  { %3325 = vmatprep.subr.bf16.mxu0 %v4011_v0  ;;  %3305 = vmatprep.subr.bf16.mxu1 %v4011_v0 }
 0x119   :  { %3326 = vmatpush3.bf16.msra.mxu0 %v3752_v8  ;;  %3306 = vmatpush3.bf16.msra.mxu1 %v3753_v9 }
 0x11a   :  { %3327 = vmatprep.subr.bf16.mxu0 %v4011_v0  ;;  %3307 = vmatprep.subr.bf16.mxu1 %v4011_v0 }
 0x11d   :  { %3328 = vmatpush3.bf16.msra.mxu0 %v3754_v10  ;;  %3308 = vmatpush3.bf16.msra.mxu1 %v3755_v11 }
 0x11e   :  { %3329 = vmatprep.subr.bf16.mxu0 %v4011_v0  ;;  %3309 = vmatprep.subr.bf16.mxu1 %v4011_v0 }
 0x121   :  { %3330 = vmatpush3.bf16.msra.mxu0 %v3756_v12  ;;  %3310 = vmatpush3.bf16.msra.mxu1 %v3757_v13 }
 0x122   :  { %3331 = vmatprep.subr.bf16.mxu0 %v4011_v0  ;;  %3311 = vmatprep.subr.bf16.mxu1 %v4011_v0 }
 0x125   :  { %3332 = vmatpush3.bf16.msra.mxu0 %v3758_v14  ;;  %3312 = vmatpush3.bf16.msra.mxu1 %v3759_v15  ;;  %v3781_v14 = vld [vmem:[#allocation4 + $0x38] sm:$0xff]  }
 0x126   :  { %3333 = vmatprep.subr.bf16.mxu0 %v4011_v0  ;;  %3313 = vmatprep.subr.bf16.mxu1 %v4011_v0 }
 0x129   :  { %3334 = vmatpush3.bf16.msra.mxu0 %v3760_v16  ;;  %3314 = vmatpush3.bf16.msra.mxu1 %v3761_v17  ;;  %v3783_v16 = vld [vmem:[#allocation4 + $0x30] sm:$0xff]   ;;  %v3785_v17 = vld [vmem:[#allocation4 + $0x28] sm:$0xff]  }
 0x12a   :  { %3335 = vmatprep.subr.bf16.mxu0 %v4011_v0  ;;  %3315 = vmatprep.subr.bf16.mxu1 %v4011_v0 }
 0x12d   :  { %3336 = vmatpush3.bf16.msra.mxu0 %v3762_v18  ;;  %3316 = vmatpush3.bf16.msra.mxu1 %v3763_v19  ;;  %v3787_v18 = vld [vmem:[#allocation4 + $0x20] sm:$0xff]  }
 0x12e   :  { %3361 = vmatprep.subr.bf16.mxu0 %v4011_v0  ;;  %3341 = vmatprep.subr.bf16.mxu1 %v4011_v0 }
 0x1d0   :  { %v504_v21 = vpop.f32.mrf.mxu1  ;;  %v611_v22 = vpop.f32.mrf.mxu0 }
 0x1d1   :  { %v505_v23 = vadd.f32 %v504_v21, %v396_v61  ;;  %v724_v24 = vadd.f32 %v611_v22, %v4121_v46  ;;  %v3769_v46 = vld [vmem:[#allocation4 + $0x10] sm:$0xff]   ;;  %v3786_v61 = vld [vmem:[#allocation7 + $0x20] sm:$0xff]  }
 0x1d2   :  { %v3279_v25 = vpop.f32.mrf.mxu1  ;;  %v3299_v26 = vpop.f32.mrf.mxu0 }
 0x1d3   :  { %v510_v27 = vadd.f32 %v4154_v20, %v505_v23  ;;  %3910 = vtanh.f32 %v724_v24  ;;  %v3789_v23 = vld [vmem:[#allocation4 + $0x18] sm:$0xff]   ;;  %v3791_v26 = vld [vmem:[#allocation4 + $0x10] sm:$0xff]  }
 0x1d4   :  { %v507_v28 = vpop.f32.mrf.mxu1  ;;  %v614_v29 = vpop.f32.mrf.mxu0 }
 0x1d5   :  { %3912 = vtanh.f32 %v510_v27  ;;  %v3793_v27 = vld [vmem:[#allocation4 + $0x8] sm:$0xff]   ;;  %v3795_v28 = vld [vmem:[#allocation4] sm:$0xff]  }
 0x1d6   :  { %v3280_v30 = vpop.f32.mrf.mxu1  ;;  %v3300_v31 = vpop.f32.mrf.mxu0 }
 0x1d7   :  { %v3796_v30 = vld [vmem:[#allocation4 + $0x78] sm:$0xff]  }
 0x1d8   :  { %v3797_v31 = vld [vmem:[#allocation7 + $0x38] sm:$0xff]  }
 0x1e0   :  { %v3911_v32 = vpop.eup %3910 }
 0x1e1   :  { %v726_v34 = vpack.c.bf16 %v3911_v32, %v3911_v32  ;;  %v3798_v32 = vld [vmem:[#allocation4 + $0x70] sm:$0xff]  }
 0x1e2   :  { %v3913_v35 = vpop.eup %3912 }
 0x1e3   :  { %512 = vst [vmem:[#allocation9] sm:$0xff] %v3913_v35  ;;  %3338 = vmatmul.mubr.bf16.vlgmr.msra.gmra.mxu0 %v726_v34  ;;  %v617_v37 = vpack.c.bf16 %v3913_v35, %v3913_v35  ;;  %v3801_v35 = vld [vmem:[#allocation7 + $0x28] sm:$0xff]  }
 0x1e4   :  { %3362 = vmatpush3.bf16.msra.mxu0 %v3772_v33  ;;  %3377 = vmatprep.mubr.msk.bf16.mxu0 %vm4012_vm0, %v4011_v0  ;;  %v3799_v33 = vld [vmem:[#allocation7 + $0x30] sm:$0xff]  }
 0x1e5   :  { %3318 = vmatmul.mubr.bf16.vlgmr.msra.gmra.mxu1 %v617_v37  ;;  %3363 = vmatprep.subr.bf16.mxu0 %v4011_v0  ;;  %v3803_v37 = vld [vmem:[#allocation7 + $0x20] sm:$0xff]  }
 0x1e6   :  { %3342 = vmatpush3.bf16.msra.mxu1 %v3764_v36  ;;  %3357 = vmatprep.mubr.msk.bf16.mxu1 %vm4012_vm0, %v4011_v0  ;;  %v3802_v36 = vld [vmem:[#allocation4 + $0x60] sm:$0xff]  }
 0x1e7   :  { %3343 = vmatprep.subr.bf16.mxu1 %v4011_v0 }
 0x1e8   :  { %3364 = vmatpush3.bf16.msra.mxu0 %v3773_v38  ;;  %v3804_v38 = vld [vmem:[#allocation4 + $0x58] sm:$0xff]  }
 0x1e9   :  { %3365 = vmatprep.subr.bf16.mxu0 %v4011_v0 }
 0x1ea   :  { %3344 = vmatpush3.bf16.msra.mxu1 %v3765_v39  ;;  %v3805_v39 = vld [vmem:[#allocation7 + $0x18] sm:$0xff]  }
 0x1eb   :  { %3345 = vmatprep.subr.bf16.mxu1 %v4011_v0 }
 0x1ec   :  { %3366 = vmatpush3.bf16.msra.mxu0 %v3774_v40  ;;  %v3806_v40 = vld [vmem:[#allocation4 + $0x50] sm:$0xff]  }
 0x1ed   :  { %3367 = vmatprep.subr.bf16.mxu0 %v4011_v0 }
 0x1ee   :  { %3346 = vmatpush3.bf16.msra.mxu1 %v3766_v42  ;;  %v3807_v42 = vld [vmem:[#allocation7 + $0x10] sm:$0xff]  }
 0x1ef   :  { %3347 = vmatprep.subr.bf16.mxu1 %v4011_v0 }
 0x1f0   :  { %3368 = vmatpush3.bf16.msra.mxu0 %v3775_v51 }
 0x1f1   :  { %3369 = vmatprep.subr.bf16.mxu0 %v4011_v0 }
 0x1f2   :  { %3348 = vmatpush3.bf16.msra.mxu1 %v3767_v43  ;;  %v3808_v43 = vld [vmem:[#allocation4 + $0x48] sm:$0xff]  }
 0x1f3   :  { %3349 = vmatprep.subr.bf16.mxu1 %v4011_v0 }
 0x1f4   :  { %3370 = vmatpush3.bf16.msra.mxu0 %v3776_v53 }
 0x1f5   :  { %3371 = vmatprep.subr.bf16.mxu0 %v4011_v0 }
 0x1f6   :  { %3350 = vmatpush3.bf16.msra.mxu1 %v3768_v45  ;;  %v3809_v45 = vld [vmem:[#allocation7 + $0x8] sm:$0xff]  }
 0x1f7   :  { %3351 = vmatprep.subr.bf16.mxu1 %v4011_v0 }
 0x1f8   :  { %3372 = vmatpush3.bf16.msra.mxu0 %v3777_v55 }
 0x1f9   :  { %3373 = vmatprep.subr.bf16.mxu0 %v4011_v0 }
 0x1fa   :  { %3352 = vmatpush3.bf16.msra.mxu1 %v3769_v46  ;;  %v3810_v46 = vld [vmem:[#allocation4 + $0x40] sm:$0xff]  }
 0x1fb   :  { %3353 = vmatprep.subr.bf16.mxu1 %v4011_v0 }
 0x1fc   :  { %3374 = vmatpush3.bf16.msra.mxu0 %v3778_v56 }
 0x1fd   :  { %3375 = vmatprep.subr.bf16.mxu0 %v4011_v0 }
 0x1fe   :  { %3354 = vmatpush3.bf16.msra.mxu1 %v3770_v47  ;;  %v3811_v47 = vld [vmem:[#allocation7] sm:$0xff]  }
 0x1ff   :  { %3355 = vmatprep.subr.bf16.mxu1 %v4011_v0 }
 0x200   :  { %3376 = vmatpush3.bf16.msra.mxu0 %v3779_v57 }
 0x201   :  { %3401 = vmatprep.subr.bf16.mxu0 %v4011_v0 }
 0x202   :  { %3356 = vmatpush3.bf16.msra.mxu1 %v3771_v49 }
 0x203   :  { %3381 = vmatprep.subr.bf16.mxu1 %v4011_v0 }
 0x205   :  { %3358 = vmatmul.mubr.bf16.vlgmr.msra.gmra.mxu1 %v726_v34  ;;  %v3800_v34 = vld [vmem:[#allocation4 + $0x68] sm:$0xff]  }
 0x206   :  { %3397 = vmatprep.mubr.msk.bf16.mxu1 %vm4012_vm0, %v4011_v0  ;;  %3382 = vmatpush3.bf16.msra.mxu1 %v3780_v58 }
 0x207   :  { %3383 = vmatprep.subr.bf16.mxu1 %v4011_v0 }
 0x20a   :  { %3384 = vmatpush3.bf16.msra.mxu1 %v3782_v59 }
 0x20b   :  { %3385 = vmatprep.subr.bf16.mxu1 %v4011_v0 }
 0x20e   :  { %3386 = vmatpush3.bf16.msra.mxu1 %v3784_v60 }
 0x20f   :  { %3387 = vmatprep.subr.bf16.mxu1 %v4011_v0 }
 0x212   :  { %3388 = vmatpush3.bf16.msra.mxu1 %v3786_v61 }
 0x213   :  { %3389 = vmatprep.subr.bf16.mxu1 %v4011_v0 }
 0x216   :  { %3390 = vmatpush3.bf16.msra.mxu1 %v3788_v62 }
 0x217   :  { %3391 = vmatprep.subr.bf16.mxu1 %v4011_v0 }
 0x21a   :  { %3392 = vmatpush3.bf16.msra.mxu1 %v3790_v63 }
 0x21b   :  { %3393 = vmatprep.subr.bf16.mxu1 %v4011_v0 }
 0x21e   :  { %3394 = vmatpush3.bf16.msra.mxu1 %v3792_v1 }
 0x21f   :  { %3395 = vmatprep.subr.bf16.mxu1 %v4011_v0 }
 0x222   :  { %3396 = vmatpush3.bf16.msra.mxu1 %v3794_v2 }
 0x223   :  { %3421 = vmatprep.subr.bf16.mxu1 %v4011_v0 }
 0x2a3   :  { %v825_v3 = vpop.f32.mrf.mxu0 }
 0x2a5   :  { %v716_v4 = vpop.f32.mrf.mxu1  ;;  %v3339_v5 = vpop.f32.mrf.mxu0 }
 0x2a6   :  { %v826_v6 = vadd.f32 %v825_v3, %v716_v4  ;;  %v3812_v5 = vld [vmem:[#allocation4 + $0x38] sm:$0xff]  }
 0x2a7   :  { %v3319_v7 = vpop.f32.mrf.mxu1  ;;  %v828_v8 = vpop.f32.mrf.mxu0 }
 0x2a8   :  { %v831_v9 = vadd.f32 %v4154_v20, %v826_v6 }
 0x2a9   :  { %v719_v10 = vpop.f32.mrf.mxu1  ;;  %v3340_v11 = vpop.f32.mrf.mxu0 }
 0x2aa   :  { %3914 = vtanh.f32 %v831_v9  ;;  %v3820_v9 = vld [vmem:[#allocation4 + $0x78] sm:$0xff]   ;;  %v3813_v10 = vld [vmem:[#allocation4 + $0x30] sm:$0xff]   ;;  %v3814_v11 = vld [vmem:[#allocation4 + $0x28] sm:$0xff]  }
 0x2ab   :  { %v3320_v12 = vpop.f32.mrf.mxu1 }
 0x2ac   :  { %v3822_v12 = vld [vmem:[#allocation4 + $0x68] sm:$0xff]  }
 0x2b7   :  { %v3915_v13 = vpop.eup %3914 }
 0x2b8   :  { %834 = vst [vmem:[#allocation9 + $0x8] sm:$0xff] %v3915_v13  ;;  %v939_v15 = vpack.c.bf16 %v3915_v13, %v3915_v13  ;;  %v3815_v13 = vld [vmem:[#allocation4 + $0x20] sm:$0xff]  }
 0x2ba   :  { %3378 = vmatmul.mubr.bf16.vlgmr.msra.gmra.mxu0 %v939_v15  ;;  %v3817_v15 = vld [vmem:[#allocation4 + $0x10] sm:$0xff]  }
 0x2bb   :  { %3402 = vmatpush3.bf16.msra.mxu0 %v3781_v14  ;;  %3417 = vmatprep.mubr.msk.bf16.mxu0 %vm4012_vm0, %v4011_v0  ;;  %v3816_v14 = vld [vmem:[#allocation4 + $0x18] sm:$0xff]  }
 0x2bc   :  { %3403 = vmatprep.subr.bf16.mxu0 %v4011_v0 }
 0x2bf   :  { %3404 = vmatpush3.bf16.msra.mxu0 %v3783_v16  ;;  %v3818_v16 = vld [vmem:[#allocation4 + $0x8] sm:$0xff]  }
 0x2c0   :  { %3405 = vmatprep.subr.bf16.mxu0 %v4011_v0 }
 0x2c3   :  { %3406 = vmatpush3.bf16.msra.mxu0 %v3785_v17  ;;  %v3819_v17 = vld [vmem:[#allocation4] sm:$0xff]  }
 0x2c4   :  { %3407 = vmatprep.subr.bf16.mxu0 %v4011_v0 }
 0x2c5   :  { %v933_v19 = vpop.f32.mrf.mxu1 }
 0x2c6   :  { %v1046_v21 = vadd.f32 %v933_v19, %v4117_v41  ;;  %v3824_v19 = vld [vmem:[#allocation4 + $0x58] sm:$0xff]  }
 0x2c7   :  { %v3359_v22 = vpop.f32.mrf.mxu1  ;;  %3408 = vmatpush3.bf16.msra.mxu0 %v3787_v18  ;;  %v3823_v18 = vld [vmem:[#allocation4 + $0x60] sm:$0xff]  }
 0x2c8   :  { %3916 = vtanh.f32 %v1046_v21  ;;  %3409 = vmatprep.subr.bf16.mxu0 %v4011_v0  ;;  %v3825_v21 = vld [vmem:[#allocation4 + $0x50] sm:$0xff]   ;;  %v3826_v22 = vld [vmem:[#allocation4 + $0x48] sm:$0xff]  }
 0x2c9   :  { %v936_v24 = vpop.f32.mrf.mxu1 }
 0x2ca   :  { %v3828_v24 = vld [vmem:[#allocation7 + $0x38] sm:$0xff]  }
 0x2cb   :  { %v3360_v25 = vpop.f32.mrf.mxu1  ;;  %3410 = vmatpush3.bf16.msra.mxu0 %v3789_v23  ;;  %v3827_v23 = vld [vmem:[#allocation4 + $0x40] sm:$0xff]  }
 0x2cc   :  { %3411 = vmatprep.subr.bf16.mxu0 %v4011_v0  ;;  %v3830_v25 = vld [vmem:[#allocation7 + $0x30] sm:$0xff]  }
 0x2cf   :  { %3412 = vmatpush3.bf16.msra.mxu0 %v3791_v26  ;;  %v3832_v26 = vld [vmem:[#allocation7 + $0x28] sm:$0xff]  }
 0x2d0   :  { %3413 = vmatprep.subr.bf16.mxu0 %v4011_v0 }
 0x2d3   :  { %3414 = vmatpush3.bf16.msra.mxu0 %v3793_v27  ;;  %v3834_v27 = vld [vmem:[#allocation7 + $0x20] sm:$0xff]  }
 0x2d4   :  { %3415 = vmatprep.subr.bf16.mxu0 %v4011_v0 }
 0x2d5   :  { %v3917_v41 = vpop.eup %3916 }
 0x2d6   :  { %v1048_v29 = vpack.c.bf16 %v3917_v41, %v3917_v41  ;;  %v3838_v41 = vld [vmem:[#allocation7 + $0x10] sm:$0xff]  }
 0x2d7   :  { %3416 = vmatpush3.bf16.msra.mxu0 %v3795_v28  ;;  %v3836_v28 = vld [vmem:[#allocation7 + $0x18] sm:$0xff]  }
 0x2d8   :  { %3398 = vmatmul.mubr.bf16.vlgmr.msra.gmra.mxu1 %v1048_v29  ;;  %3441 = vmatprep.subr.bf16.mxu0 %v4011_v0 }
 0x2d9   :  { %3437 = vmatprep.mubr.msk.bf16.mxu1 %vm4012_vm0, %v4011_v0  ;;  %3422 = vmatpush3.bf16.msra.mxu1 %v3796_v30  ;;  %v3842_v30 = vld [vmem:[#allocation7] sm:$0xff]  }
 0x2da   :  { %3418 = vmatmul.mubr.bf16.vlgmr.msra.gmra.mxu0 %v1048_v29  ;;  %3423 = vmatprep.subr.bf16.mxu1 %v4011_v0  ;;  %v3840_v29 = vld [vmem:[#allocation7 + $0x8] sm:$0xff]  }
 0x2db   :  { %3457 = vmatprep.mubr.msk.bf16.mxu0 %vm4012_vm0, %v4011_v0  ;;  %3442 = vmatpush3.bf16.msra.mxu0 %v3797_v31 }
 0x2dc   :  { %3443 = vmatprep.subr.bf16.mxu0 %v4011_v0 }
 0x2dd   :  { %3424 = vmatpush3.bf16.msra.mxu1 %v3798_v32 }
 0x2de   :  { %3425 = vmatprep.subr.bf16.mxu1 %v4011_v0 }
 0x2df   :  { %3444 = vmatpush3.bf16.msra.mxu0 %v3799_v33 }
 0x2e0   :  { %3445 = vmatprep.subr.bf16.mxu0 %v4011_v0 }
 0x2e1   :  { %3426 = vmatpush3.bf16.msra.mxu1 %v3800_v34 }
 0x2e2   :  { %3427 = vmatprep.subr.bf16.mxu1 %v4011_v0 }
 0x2e3   :  { %3446 = vmatpush3.bf16.msra.mxu0 %v3801_v35 }
 0x2e4   :  { %3447 = vmatprep.subr.bf16.mxu0 %v4011_v0 }
 0x2e5   :  { %3428 = vmatpush3.bf16.msra.mxu1 %v3802_v36 }
 0x2e6   :  { %3429 = vmatprep.subr.bf16.mxu1 %v4011_v0 }
 0x2e7   :  { %3448 = vmatpush3.bf16.msra.mxu0 %v3803_v37 }
 0x2e8   :  { %3449 = vmatprep.subr.bf16.mxu0 %v4011_v0 }
 0x2e9   :  { %3430 = vmatpush3.bf16.msra.mxu1 %v3804_v38 }
 0x2ea   :  { %3431 = vmatprep.subr.bf16.mxu1 %v4011_v0 }
 0x2eb   :  { %3450 = vmatpush3.bf16.msra.mxu0 %v3805_v39 }
 0x2ec   :  { %3451 = vmatprep.subr.bf16.mxu0 %v4011_v0 }
 0x2ed   :  { %3432 = vmatpush3.bf16.msra.mxu1 %v3806_v40 }
 0x2ee   :  { %3433 = vmatprep.subr.bf16.mxu1 %v4011_v0 }
 0x2ef   :  { %3452 = vmatpush3.bf16.msra.mxu0 %v3807_v42 }
 0x2f0   :  { %3453 = vmatprep.subr.bf16.mxu0 %v4011_v0 }
 0x2f1   :  { %3434 = vmatpush3.bf16.msra.mxu1 %v3808_v43  ;;  %v3829_v43 = vld [vmem:[#allocation4 + $0x38] sm:$0xff]  }
 0x2f2   :  { %3435 = vmatprep.subr.bf16.mxu1 %v4011_v0 }
 0x2f3   :  { %3454 = vmatpush3.bf16.msra.mxu0 %v3809_v45 }
 0x2f4   :  { %3455 = vmatprep.subr.bf16.mxu0 %v4011_v0 }
 0x2f5   :  { %3436 = vmatpush3.bf16.msra.mxu1 %v3810_v46  ;;  %v3831_v46 = vld [vmem:[#allocation4 + $0x30] sm:$0xff]  }
 0x2f6   :  { %3461 = vmatprep.subr.bf16.mxu1 %v4011_v0 }
 0x2f7   :  { %3456 = vmatpush3.bf16.msra.mxu0 %v3811_v47  ;;  %v3833_v47 = vld [vmem:[#allocation4 + $0x28] sm:$0xff]  }
 0x2f8   :  { %3481 = vmatprep.subr.bf16.mxu0 %v4011_v0 }
 0x37a   :  { %v1038_v49 = vpop.f32.mrf.mxu0 }
 0x37c   :  { %v3379_v51 = vpop.f32.mrf.mxu0 }
 0x37e   :  { %v1041_v53 = vpop.f32.mrf.mxu0 }
 0x380   :  { %v3380_v55 = vpop.f32.mrf.mxu0 }
 0x398   :  { %v1147_v56 = vpop.f32.mrf.mxu1 }
 0x399   :  { %v1148_v57 = vadd.f32 %v1147_v56, %v1038_v49  ;;  %v3835_v49 = vld [vmem:[#allocation4 + $0x20] sm:$0xff]   ;;  %v3837_v56 = vld [vmem:[#allocation4 + $0x18] sm:$0xff]  }
 0x39a   :  { %v3399_v58 = vpop.f32.mrf.mxu1  ;;  %v1255_v59 = vpop.f32.mrf.mxu0 }
 0x39b   :  { %v1153_v60 = vadd.f32 %v4154_v20, %v1148_v57  ;;  %v1368_v61 = vadd.f32 %v1255_v59, %v4119_v44  ;;  %v3821_v44 = vld [vmem:[#allocation4 + $0x70] sm:$0xff]  }
 0x39c   :  { %v1150_v62 = vpop.f32.mrf.mxu1  ;;  %v3419_v63 = vpop.f32.mrf.mxu0  ;;  %v3839_v59 = vld [vmem:[#allocation4 + $0x10] sm:$0xff]  }
 0x39d   :  { %3918 = vtanh.f32 %v1153_v60  ;;  %v3841_v60 = vld [vmem:[#allocation4 + $0x8] sm:$0xff]   ;;  %v3844_v63 = vld [vmem:[#allocation4 + $0x78] sm:$0xff]  }
 0x39e   :  { %3920 = vtanh.f32 %v1368_v61  ;;  %v3400_v1 = vpop.f32.mrf.mxu1  ;;  %v1258_v2 = vpop.f32.mrf.mxu0  ;;  %v3843_v61 = vld [vmem:[#allocation4] sm:$0xff]  }
 0x39f   :  { %v3845_v1 = vld [vmem:[#allocation7 + $0x38] sm:$0xff]   ;;  %v3846_v2 = vld [vmem:[#allocation4 + $0x70] sm:$0xff]  }
 0x3a0   :  { %v3420_v3 = vpop.f32.mrf.mxu0 }
 0x3a1   :  { %v3847_v3 = vld [vmem:[#allocation7 + $0x30] sm:$0xff]  }
 0x3aa   :  { %v3919_v4 = vpop.eup %3918 }
 0x3ab   :  { %v3921_v6 = vpop.eup %3920  ;;  %1156 = vst [vmem:[#allocation9 + $0x10] sm:$0xff] %v3919_v4  ;;  %v1261_v7 = vpack.c.bf16 %v3919_v4, %v3919_v4  ;;  %v3848_v4 = vld [vmem:[#allocation4 + $0x68] sm:$0xff]  }
 0x3ac   :  { %v1370_v8 = vpack.c.bf16 %v3921_v6, %v3921_v6  ;;  %v3850_v6 = vld [vmem:[#allocation4 + $0x60] sm:$0xff]  }
 0x3ad   :  { %3438 = vmatmul.mubr.bf16.vlgmr.msra.gmra.mxu1 %v1261_v7  ;;  %v3851_v7 = vld [vmem:[#allocation7 + $0x20] sm:$0xff]  }
 0x3ae   :  { %3458 = vmatmul.mubr.bf16.vlgmr.msra.gmra.mxu0 %v1370_v8  ;;  %3462 = vmatpush3.bf16.msra.mxu1 %v3812_v5  ;;  %v3849_v5 = vld [vmem:[#allocation7 + $0x28] sm:$0xff]  }
 0x3af   :  { %3463 = vmatprep.subr.bf16.mxu1 %v4011_v0  ;;  %3477 = vmatprep.mubr.msk.bf16.mxu1 %vm4012_vm0, %v4011_v0 }
 0x3b0   :  { %3482 = vmatpush3.bf16.msra.mxu0 %v3820_v9  ;;  %3497 = vmatprep.mubr.msk.bf16.mxu0 %vm4012_vm0, %v4011_v0  ;;  %v3853_v9 = vld [vmem:[#allocation7 + $0x18] sm:$0xff]  }
 0x3b1   :  { %3483 = vmatprep.subr.bf16.mxu0 %v4011_v0 }
 0x3b2   :  { %3464 = vmatpush3.bf16.msra.mxu1 %v3813_v10  ;;  %v3854_v10 = vld [vmem:[#allocation4 + $0x50] sm:$0xff]  }
 0x3b3   :  { %3465 = vmatprep.subr.bf16.mxu1 %v4011_v0 }
 0x3b4   :  { %3484 = vmatpush3.bf16.msra.mxu0 %v3821_v44  ;;  %v3855_v44 = vld [vmem:[#allocation7 + $0x10] sm:$0xff]  }
 0x3b5   :  { %3485 = vmatprep.subr.bf16.mxu0 %v4011_v0 }
 0x3b6   :  { %3466 = vmatpush3.bf16.msra.mxu1 %v3814_v11  ;;  %v3856_v11 = vld [vmem:[#allocation4 + $0x48] sm:$0xff]  }
 0x3b7   :  { %3467 = vmatprep.subr.bf16.mxu1 %v4011_v0 }
 0x3b8   :  { %3486 = vmatpush3.bf16.msra.mxu0 %v3822_v12  ;;  %v3857_v12 = vld [vmem:[#allocation7 + $0x8] sm:$0xff]  }
 0x3b9   :  { %3487 = vmatprep.subr.bf16.mxu0 %v4011_v0 }
 0x3ba   :  { %3468 = vmatpush3.bf16.msra.mxu1 %v3815_v13  ;;  %v3858_v13 = vld [vmem:[#allocation4 + $0x40] sm:$0xff]  }
 0x3bb   :  { %3469 = vmatprep.subr.bf16.mxu1 %v4011_v0 }
 0x3bc   :  { %3488 = vmatpush3.bf16.msra.mxu0 %v3823_v18 }
 0x3bd   :  { %3489 = vmatprep.subr.bf16.mxu0 %v4011_v0 }
 0x3be   :  { %3470 = vmatpush3.bf16.msra.mxu1 %v3816_v14  ;;  %v3859_v14 = vld [vmem:[#allocation7] sm:$0xff]  }
 0x3bf   :  { %3471 = vmatprep.subr.bf16.mxu1 %v4011_v0 }
 0x3c0   :  { %3490 = vmatpush3.bf16.msra.mxu0 %v3824_v19 }
 0x3c1   :  { %3491 = vmatprep.subr.bf16.mxu0 %v4011_v0 }
 0x3c2   :  { %3472 = vmatpush3.bf16.msra.mxu1 %v3817_v15 }
 0x3c3   :  { %3473 = vmatprep.subr.bf16.mxu1 %v4011_v0 }
 0x3c4   :  { %3492 = vmatpush3.bf16.msra.mxu0 %v3825_v21 }
 0x3c5   :  { %3493 = vmatprep.subr.bf16.mxu0 %v4011_v0 }
 0x3c6   :  { %3474 = vmatpush3.bf16.msra.mxu1 %v3818_v16 }
 0x3c7   :  { %3475 = vmatprep.subr.bf16.mxu1 %v4011_v0 }
 0x3c8   :  { %3494 = vmatpush3.bf16.msra.mxu0 %v3826_v22 }
 0x3c9   :  { %3495 = vmatprep.subr.bf16.mxu0 %v4011_v0 }
 0x3ca   :  { %3476 = vmatpush3.bf16.msra.mxu1 %v3819_v17 }
 0x3cb   :  { %3501 = vmatprep.subr.bf16.mxu1 %v4011_v0 }
 0x3cc   :  { %3496 = vmatpush3.bf16.msra.mxu0 %v3827_v23 }
 0x3cd   :  { %3478 = vmatmul.mubr.bf16.vlgmr.msra.gmra.mxu1 %v1370_v8  ;;  %3521 = vmatprep.subr.bf16.mxu0 %v4011_v0  ;;  %v3852_v8 = vld [vmem:[#allocation4 + $0x58] sm:$0xff]  }
 0x3ce   :  { %3517 = vmatprep.mubr.msk.bf16.mxu1 %vm4012_vm0, %v4011_v0  ;;  %3502 = vmatpush3.bf16.msra.mxu1 %v3828_v24 }
 0x3cf   :  { %3503 = vmatprep.subr.bf16.mxu1 %v4011_v0 }
 0x3d2   :  { %3504 = vmatpush3.bf16.msra.mxu1 %v3830_v25 }
 0x3d3   :  { %3505 = vmatprep.subr.bf16.mxu1 %v4011_v0 }
 0x3d6   :  { %3506 = vmatpush3.bf16.msra.mxu1 %v3832_v26 }
 0x3d7   :  { %3507 = vmatprep.subr.bf16.mxu1 %v4011_v0 }
 0x3da   :  { %3508 = vmatpush3.bf16.msra.mxu1 %v3834_v27 }
 0x3db   :  { %3509 = vmatprep.subr.bf16.mxu1 %v4011_v0 }
 0x3de   :  { %3510 = vmatpush3.bf16.msra.mxu1 %v3836_v28 }
 0x3df   :  { %3511 = vmatprep.subr.bf16.mxu1 %v4011_v0 }
 0x3e2   :  { %3512 = vmatpush3.bf16.msra.mxu1 %v3838_v41 }
 0x3e3   :  { %3513 = vmatprep.subr.bf16.mxu1 %v4011_v0 }
 0x3e6   :  { %3514 = vmatpush3.bf16.msra.mxu1 %v3840_v29 }
 0x3e7   :  { %3515 = vmatprep.subr.bf16.mxu1 %v4011_v0 }
 0x3ea   :  { %3516 = vmatpush3.bf16.msra.mxu1 %v3842_v30 }
 0x3eb   :  { %3541 = vmatprep.subr.bf16.mxu1 %v4011_v0 }
 0x46d   :  { %v1360_v31 = vpop.f32.mrf.mxu1 }
 0x46e   :  { %v1469_v32 = vpop.f32.mrf.mxu0 }
 0x46f   :  { %v1470_v33 = vadd.f32 %v1469_v32, %v1360_v31  ;;  %v3439_v34 = vpop.f32.mrf.mxu1  ;;  %v3860_v31 = vld [vmem:[#allocation4 + $0x38] sm:$0xff]  }
 0x470   :  { %v3459_v35 = vpop.f32.mrf.mxu0 }
 0x471   :  { %v1475_v36 = vadd.f32 %v4154_v20, %v1470_v33  ;;  %v1363_v37 = vpop.f32.mrf.mxu1  ;;  %v3868_v35 = vld [vmem:[#allocation4 + $0x78] sm:$0xff]  }
 0x472   :  { %v1472_v38 = vpop.f32.mrf.mxu0  ;;  %v3862_v37 = vld [vmem:[#allocation4 + $0x28] sm:$0xff]  }
 0x473   :  { %3922 = vtanh.f32 %v1475_v36  ;;  %v3440_v39 = vpop.f32.mrf.mxu1  ;;  %v3861_v36 = vld [vmem:[#allocation4 + $0x30] sm:$0xff]   ;;  %v3870_v38 = vld [vmem:[#allocation4 + $0x68] sm:$0xff]  }
 0x474   :  { %v3460_v40 = vpop.f32.mrf.mxu0  ;;  %v3863_v39 = vld [vmem:[#allocation4 + $0x20] sm:$0xff]  }
 0x475   :  { %v3864_v40 = vld [vmem:[#allocation4 + $0x18] sm:$0xff]  }
 0x480   :  { %v3923_v42 = vpop.eup %3922 }
 0x481   :  { %1478 = vst [vmem:[#allocation9 + $0x18] sm:$0xff] %v3923_v42  ;;  %v1583_v45 = vpack.c.bf16 %v3923_v42, %v3923_v42  ;;  %v3865_v42 = vld [vmem:[#allocation4 + $0x10] sm:$0xff]  }
 0x483   :  { %3498 = vmatmul.mubr.bf16.vlgmr.msra.gmra.mxu0 %v1583_v45  ;;  %v3867_v45 = vld [vmem:[#allocation4] sm:$0xff]  }
 0x484   :  { %3522 = vmatpush3.bf16.msra.mxu0 %v3829_v43  ;;  %3537 = vmatprep.mubr.msk.bf16.mxu0 %vm4012_vm0, %v4011_v0  ;;  %v3866_v43 = vld [vmem:[#allocation4 + $0x8] sm:$0xff]  }
 0x485   :  { %3523 = vmatprep.subr.bf16.mxu0 %v4011_v0 }
 0x488   :  { %3524 = vmatpush3.bf16.msra.mxu0 %v3831_v46  ;;  %v3871_v46 = vld [vmem:[#allocation4 + $0x60] sm:$0xff]  }
 0x489   :  { %3525 = vmatprep.subr.bf16.mxu0 %v4011_v0 }
 0x48c   :  { %3526 = vmatpush3.bf16.msra.mxu0 %v3833_v47  ;;  %v3872_v47 = vld [vmem:[#allocation4 + $0x58] sm:$0xff]  }
 0x48d   :  { %v1577_v51 = vpop.f32.mrf.mxu1  ;;  %3527 = vmatprep.subr.bf16.mxu0 %v4011_v0 }
 0x48e   :  { %v1690_v53 = vadd.f32 %v1577_v51, %v4125_v50  ;;  %v3874_v51 = vld [vmem:[#allocation4 + $0x48] sm:$0xff]  }
 0x48f   :  { %v3479_v55 = vpop.f32.mrf.mxu1 }
 0x490   :  { %3924 = vtanh.f32 %v1690_v53  ;;  %3528 = vmatpush3.bf16.msra.mxu0 %v3835_v49  ;;  %v3873_v49 = vld [vmem:[#allocation4 + $0x50] sm:$0xff]   ;;  %v3875_v53 = vld [vmem:[#allocation4 + $0x40] sm:$0xff]   ;;  %v3876_v55 = vld [vmem:[#allocation7 + $0x38] sm:$0xff]  }
 0x491   :  { %v1580_v57 = vpop.f32.mrf.mxu1  ;;  %3529 = vmatprep.subr.bf16.mxu0 %v4011_v0 }
 0x492   :  { %v3880_v57 = vld [vmem:[#allocation7 + $0x28] sm:$0xff]  }
 0x493   :  { %v3480_v58 = vpop.f32.mrf.mxu1 }
 0x494   :  { %3530 = vmatpush3.bf16.msra.mxu0 %v3837_v56  ;;  %v3878_v56 = vld [vmem:[#allocation7 + $0x30] sm:$0xff]   ;;  %v3882_v58 = vld [vmem:[#allocation7 + $0x20] sm:$0xff]  }
 0x495   :  { %3531 = vmatprep.subr.bf16.mxu0 %v4011_v0 }
 0x498   :  { %3532 = vmatpush3.bf16.msra.mxu0 %v3839_v59  ;;  %v3884_v59 = vld [vmem:[#allocation7 + $0x18] sm:$0xff]  }
 0x499   :  { %3533 = vmatprep.subr.bf16.mxu0 %v4011_v0 }
 0x49c   :  { %3534 = vmatpush3.bf16.msra.mxu0 %v3841_v60  ;;  %v3886_v60 = vld [vmem:[#allocation7 + $0x10] sm:$0xff]  }
 0x49d   :  { %v3925_v62 = vpop.eup %3924  ;;  %3535 = vmatprep.subr.bf16.mxu0 %v4011_v0 }
 0x49e   :  { %v1692_v50 = vpack.c.bf16 %v3925_v62, %v3925_v62  ;;  %v3890_v62 = vld [vmem:[#allocation7] sm:$0xff]  }
 0x4a0   :  { %3536 = vmatpush3.bf16.msra.mxu0 %v3843_v61  ;;  %3518 = vmatmul.mubr.bf16.vlgmr.msra.gmra.mxu1 %v1692_v50  ;;  %v3888_v61 = vld [vmem:[#allocation7 + $0x8] sm:$0xff]  }
 0x4a1   :  { %3561 = vmatprep.subr.bf16.mxu0 %v4011_v0  ;;  %3557 = vmatprep.mubr.msk.bf16.mxu1 %vm4012_vm0, %v4011_v0 }
 0x4a2   :  { %3542 = vmatpush3.bf16.msra.mxu1 %v3844_v63 }
 0x4a3   :  { %3538 = vmatmul.mubr.bf16.vlgmr.msra.gmra.mxu0 %v1692_v50  ;;  %3543 = vmatprep.subr.bf16.mxu1 %v4011_v0 }
 0x4a4   :  { %3577 = vmatprep.mubr.msk.bf16.mxu0 %vm4012_vm0, %v4011_v0  ;;  %3562 = vmatpush3.bf16.msra.mxu0 %v3845_v1 }
 0x4a5   :  { %3563 = vmatprep.subr.bf16.mxu0 %v4011_v0 }
 0x4a6   :  { %3544 = vmatpush3.bf16.msra.mxu1 %v3846_v2 }
 0x4a7   :  { %3545 = vmatprep.subr.bf16.mxu1 %v4011_v0 }
 0x4a8   :  { %3564 = vmatpush3.bf16.msra.mxu0 %v3847_v3 }
 0x4a9   :  { %3565 = vmatprep.subr.bf16.mxu0 %v4011_v0 }
 0x4aa   :  { %3546 = vmatpush3.bf16.msra.mxu1 %v3848_v4 }
 0x4ab   :  { %3547 = vmatprep.subr.bf16.mxu1 %v4011_v0 }
 0x4ac   :  { %3566 = vmatpush3.bf16.msra.mxu0 %v3849_v5 }
 0x4ad   :  { %3567 = vmatprep.subr.bf16.mxu0 %v4011_v0 }
 0x4ae   :  { %3548 = vmatpush3.bf16.msra.mxu1 %v3850_v6 }
 0x4af   :  { %3549 = vmatprep.subr.bf16.mxu1 %v4011_v0 }
 0x4b0   :  { %3568 = vmatpush3.bf16.msra.mxu0 %v3851_v7 }
 0x4b1   :  { %3569 = vmatprep.subr.bf16.mxu0 %v4011_v0 }
 0x4b2   :  { %3550 = vmatpush3.bf16.msra.mxu1 %v3852_v8 }
 0x4b3   :  { %3551 = vmatprep.subr.bf16.mxu1 %v4011_v0 }
 0x4b4   :  { %3570 = vmatpush3.bf16.msra.mxu0 %v3853_v9 }
 0x4b5   :  { %3571 = vmatprep.subr.bf16.mxu0 %v4011_v0 }
 0x4b6   :  { %3552 = vmatpush3.bf16.msra.mxu1 %v3854_v10  ;;  %v3877_v10 = vld [vmem:[#allocation4 + $0x38] sm:$0xff]  }
 0x4b7   :  { %3553 = vmatprep.subr.bf16.mxu1 %v4011_v0 }
 0x4b8   :  { %3572 = vmatpush3.bf16.msra.mxu0 %v3855_v44 }
 0x4b9   :  { %3573 = vmatprep.subr.bf16.mxu0 %v4011_v0 }
 0x4ba   :  { %3554 = vmatpush3.bf16.msra.mxu1 %v3856_v11  ;;  %v3879_v11 = vld [vmem:[#allocation4 + $0x30] sm:$0xff]  }
 0x4bb   :  { %3555 = vmatprep.subr.bf16.mxu1 %v4011_v0 }
 0x4bc   :  { %3574 = vmatpush3.bf16.msra.mxu0 %v3857_v12  ;;  %v3881_v12 = vld [vmem:[#allocation4 + $0x28] sm:$0xff]  }
 0x4bd   :  { %3575 = vmatprep.subr.bf16.mxu0 %v4011_v0 }
 0x4be   :  { %3556 = vmatpush3.bf16.msra.mxu1 %v3858_v13 }
 0x4bf   :  { %3581 = vmatprep.subr.bf16.mxu1 %v4011_v0 }
 0x4c0   :  { %3576 = vmatpush3.bf16.msra.mxu0 %v3859_v14 }
 0x4c1   :  { %3601 = vmatprep.subr.bf16.mxu0 %v4011_v0 }
 0x543   :  { %v1682_v15 = vpop.f32.mrf.mxu0 }
 0x545   :  { %v3499_v16 = vpop.f32.mrf.mxu0 }
 0x546   :  { %v3885_v16 = vld [vmem:[#allocation4 + $0x18] sm:$0xff]  }
 0x547   :  { %v1685_v17 = vpop.f32.mrf.mxu0 }
 0x549   :  { %v3500_v18 = vpop.f32.mrf.mxu0 }
 0x560   :  { %v1791_v19 = vpop.f32.mrf.mxu1 }
 0x561   :  { %v1792_v21 = vadd.f32 %v1791_v19, %v1682_v15  ;;  %v3887_v19 = vld [vmem:[#allocation4 + $0x10] sm:$0xff]  }
 0x562   :  { %v3519_v22 = vpop.f32.mrf.mxu1 }
 0x563   :  { %v1797_v23 = vadd.f32 %v4154_v20, %v1792_v21  ;;  %v1899_v24 = vpop.f32.mrf.mxu0  ;;  %v3889_v21 = vld [vmem:[#allocation4 + $0x8] sm:$0xff]   ;;  %v3891_v22 = vld [vmem:[#allocation4] sm:$0xff]  }
 0x564   :  { %v2012_v25 = vadd.f32 %v1899_v24, %v4129_v54  ;;  %v1794_v26 = vpop.f32.mrf.mxu1  ;;  %v3869_v54 = vld [vmem:[#allocation4 + $0x70] sm:$0xff]   ;;  %v3892_v24 = vld [vmem:[#allocation4 + $0x78] sm:$0xff]  }
 0x565   :  { %3926 = vtanh.f32 %v1797_v23  ;;  %v3539_v27 = vpop.f32.mrf.mxu0  ;;  %v3894_v26 = vld [vmem:[#allocation4 + $0x70] sm:$0xff]  }
 0x566   :  { %3928 = vtanh.f32 %v2012_v25  ;;  %v3520_v28 = vpop.f32.mrf.mxu1  ;;  %v3893_v25 = vld [vmem:[#allocation7 + $0x38] sm:$0xff]   ;;  %v3895_v27 = vld [vmem:[#allocation7 + $0x30] sm:$0xff]  }
 0x567   :  { %v1902_v41 = vpop.f32.mrf.mxu0  ;;  %v3896_v28 = vld [vmem:[#allocation4 + $0x68] sm:$0xff]  }
 0x568   :  { %v3897_v41 = vld [vmem:[#allocation7 + $0x28] sm:$0xff]  }
 0x569   :  { %v3540_v29 = vpop.f32.mrf.mxu0 }
 0x56a   :  { %v3898_v29 = vld [vmem:[#allocation4 + $0x60] sm:$0xff]  }
 0x572   :  { %v3927_v30 = vpop.eup %3926 }
 0x573   :  { %v3929_v32 = vpop.eup %3928  ;;  %1800 = vst [vmem:[#allocation9 + $0x20] sm:$0xff] %v3927_v30  ;;  %v1905_v33 = vpack.c.bf16 %v3927_v30, %v3927_v30  ;;  %v3899_v30 = vld [vmem:[#allocation7 + $0x20] sm:$0xff]  }
 0x574   :  { %v2014_v34 = vpack.c.bf16 %v3929_v32, %v3929_v32  ;;  %v3901_v32 = vld [vmem:[#allocation7 + $0x18] sm:$0xff]  }
 0x575   :  { %3558 = vmatmul.mubr.bf16.vlgmr.msra.gmra.mxu1 %v1905_v33  ;;  %v3902_v33 = vld [vmem:[#allocation4 + $0x50] sm:$0xff]  }
 0x576   :  { %3578 = vmatmul.mubr.bf16.vlgmr.msra.gmra.mxu0 %v2014_v34  ;;  %3582 = vmatpush3.bf16.msra.mxu1 %v3860_v31  ;;  %v3900_v31 = vld [vmem:[#allocation4 + $0x58] sm:$0xff]  }
 0x577   :  { %3583 = vmatprep.subr.bf16.mxu1 %v4011_v0  ;;  %3597 = vmatprep.mubr.msk.bf16.mxu1 %vm4012_vm0, %v4011_v0 }
 0x578   :  { %3602 = vmatpush3.bf16.msra.mxu0 %v3868_v35  ;;  %3617 = vmatprep.mubr.msk.bf16.mxu0 %vm4012_vm0, %v4011_v0  ;;  %v3904_v35 = vld [vmem:[#allocation4 + $0x48] sm:$0xff]  }
 0x579   :  { %3603 = vmatprep.subr.bf16.mxu0 %v4011_v0 }
 0x57a   :  { %3584 = vmatpush3.bf16.msra.mxu1 %v3861_v36  ;;  %v3905_v36 = vld [vmem:[#allocation7 + $0x8] sm:$0xff]  }
 0x57b   :  { %3585 = vmatprep.subr.bf16.mxu1 %v4011_v0 }
 0x57c   :  { %3604 = vmatpush3.bf16.msra.mxu0 %v3869_v54  ;;  %v3906_v54 = vld [vmem:[#allocation4 + $0x40] sm:$0xff]  }
 0x57d   :  { %3605 = vmatprep.subr.bf16.mxu0 %v4011_v0 }
 0x57e   :  { %3586 = vmatpush3.bf16.msra.mxu1 %v3862_v37  ;;  %v3907_v37 = vld [vmem:[#allocation7] sm:$0xff]  }
 0x57f   :  { %3587 = vmatprep.subr.bf16.mxu1 %v4011_v0 }
 0x580   :  { %3606 = vmatpush3.bf16.msra.mxu0 %v3870_v38 }
 0x581   :  { %3607 = vmatprep.subr.bf16.mxu0 %v4011_v0 }
 0x582   :  { %3588 = vmatpush3.bf16.msra.mxu1 %v3863_v39 }
 0x583   :  { %3589 = vmatprep.subr.bf16.mxu1 %v4011_v0 }
 0x584   :  { %3608 = vmatpush3.bf16.msra.mxu0 %v3871_v46 }
 0x585   :  { %3609 = vmatprep.subr.bf16.mxu0 %v4011_v0 }
 0x586   :  { %3590 = vmatpush3.bf16.msra.mxu1 %v3864_v40 }
 0x587   :  { %3591 = vmatprep.subr.bf16.mxu1 %v4011_v0 }
 0x588   :  { %3610 = vmatpush3.bf16.msra.mxu0 %v3872_v47  ;;  %v3940_v47 = vld [vmem:[%s4357_s4 + $0x1] ss:$0 sm:$0xff]  ;;  %s4014_s4 = smov [#allocation9]  }
 0x589   :  { %3611 = vmatprep.subr.bf16.mxu0 %v4011_v0  ;;  %s2774_s17 = sshll.u32 %s4014_s4, 4  ;;  %s2775_s17 = int_to_ptr.vmem [resolvable:$true] %s2774_s17 }
 0x58a   :  { %3592 = vmatpush3.bf16.msra.mxu1 %v3865_v42  ;;  %s3981_s18 = scalar_lea.vmem %s2775_s17, 1024  ;;  %p3986_p11 = scmp.lt.s32.totalorder %s2775_s17, %s2775_s17 }
 0x58b   :  { %3593 = vmatprep.subr.bf16.mxu1 %v4011_v0  ;;  %p3982_p10 = scmp.ne.s32.totalorder %s2775_s17, %s3981_s18  ;;  %p3987_p12 = scmp.lt.s32.totalorder %s3981_s18, %s3981_s18 }
 0x58c   :  { %3612 = vmatpush3.bf16.msra.mxu0 %v3873_v49 }
 0x58d   :  { %3613 = vmatprep.subr.bf16.mxu0 %v4011_v0  ;;  %p3988_p13 = por %p3987_p12, %p3986_p11 }
 0x58e   :  { %3594 = vmatpush3.bf16.msra.mxu1 %v3866_v43 }
 0x58f   :  { %3595 = vmatprep.subr.bf16.mxu1 %v4011_v0  ;;  %p3989_p0 = pnand %p3988_p13, %p3982_p10 }
 0x590   :  { %3614 = vmatpush3.bf16.msra.mxu0 %v3874_v51 }
 0x591   :  { %3615 = vmatprep.subr.bf16.mxu0 %v4011_v0 }
 0x592   :  { %3596 = vmatpush3.bf16.msra.mxu1 %v3867_v45 }
 0x593   :  { %3621 = vmatprep.subr.bf16.mxu1 %v4011_v0 }
 0x594   :  { %3616 = vmatpush3.bf16.msra.mxu0 %v3875_v53 }
 0x595   :  { %3598 = vmatmul.mubr.bf16.vlgmr.msra.gmra.mxu1 %v2014_v34  ;;  %3641 = vmatprep.subr.bf16.mxu0 %v4011_v0  ;;  %v3903_v34 = vld [vmem:[#allocation7 + $0x10] sm:$0xff]  }
 0x596   :  { %3637 = vmatprep.mubr.msk.bf16.mxu1 %vm4012_vm0, %v4011_v0  ;;  %3622 = vmatpush3.bf16.msra.mxu1 %v3876_v55 }
 0x597   :  { %3623 = vmatprep.subr.bf16.mxu1 %v4011_v0 }
 0x59a   :  { %3624 = vmatpush3.bf16.msra.mxu1 %v3878_v56 }
 0x59b   :  { %3625 = vmatprep.subr.bf16.mxu1 %v4011_v0 }
 0x59e   :  { %3626 = vmatpush3.bf16.msra.mxu1 %v3880_v57 }
 0x59f   :  { %3627 = vmatprep.subr.bf16.mxu1 %v4011_v0 }
 0x5a2   :  { %3628 = vmatpush3.bf16.msra.mxu1 %v3882_v58 }
 0x5a3   :  { %3629 = vmatprep.subr.bf16.mxu1 %v4011_v0 }
 0x5a6   :  { %3630 = vmatpush3.bf16.msra.mxu1 %v3884_v59 }
 0x5a7   :  { %3631 = vmatprep.subr.bf16.mxu1 %v4011_v0 }
 0x5aa   :  { %3632 = vmatpush3.bf16.msra.mxu1 %v3886_v60 }
 0x5ab   :  { %3633 = vmatprep.subr.bf16.mxu1 %v4011_v0 }
 0x5ae   :  { %3634 = vmatpush3.bf16.msra.mxu1 %v3888_v61 }
 0x5af   :  { %3635 = vmatprep.subr.bf16.mxu1 %v4011_v0 }
 0x5b2   :  { %3636 = vmatpush3.bf16.msra.mxu1 %v3890_v62 }
 0x5b3   :  { %3661 = vmatprep.subr.bf16.mxu1 %v4011_v0 }
 0x635   :  { %v2004_v50 = vpop.f32.mrf.mxu1 }
 0x636   :  { %v2113_v63 = vpop.f32.mrf.mxu0 }
 0x637   :  { %v2114_v1 = vadd.f32 %v2113_v63, %v2004_v50  ;;  %v3559_v2 = vpop.f32.mrf.mxu1 }
 0x638   :  { %v3579_v3 = vpop.f32.mrf.mxu0 }
 0x639   :  { %v2119_v4 = vadd.f32 %v4154_v20, %v2114_v1  ;;  %v2007_v5 = vpop.f32.mrf.mxu1  ;;  %v3883_v20 = vld [vmem:[#allocation4 + $0x20] sm:$0xff]  }
 0x63a   :  { %v2116_v6 = vpop.f32.mrf.mxu0 }
 0x63b   :  { %3930 = vtanh.f32 %v2119_v4  ;;  %v3560_v7 = vpop.f32.mrf.mxu1 }
 0x63c   :  { %v3580_v8 = vpop.f32.mrf.mxu0 }
 0x648   :  { %v3931_v9 = vpop.eup %3930 }
 0x649   :  { %2122 = vst [vmem:[#allocation9 + $0x28] sm:$0xff] %v3931_v9  ;;  %v2227_v44 = vpack.c.bf16 %v3931_v9, %v3931_v9 }
 0x64b   :  { %3618 = vmatmul.mubr.bf16.vlgmr.msra.gmra.mxu0 %v2227_v44 }
 0x64c   :  { %3642 = vmatpush3.bf16.msra.mxu0 %v3877_v10  ;;  %3657 = vmatprep.mubr.msk.bf16.mxu0 %vm4012_vm0, %v4011_v0 }
 0x64d   :  { %3643 = vmatprep.subr.bf16.mxu0 %v4011_v0 }
 0x650   :  { %3644 = vmatpush3.bf16.msra.mxu0 %v3879_v11 }
 0x651   :  { %3645 = vmatprep.subr.bf16.mxu0 %v4011_v0 }
 0x654   :  { %3646 = vmatpush3.bf16.msra.mxu0 %v3881_v12 }
 0x655   :  { %v2221_v13 = vpop.f32.mrf.mxu1  ;;  %3647 = vmatprep.subr.bf16.mxu0 %v4011_v0 }
 0x656   :  { %v2334_v14 = vadd.f32 %v2221_v13, %v4123_v48 }
 0x657   :  { %v3599_v15 = vpop.f32.mrf.mxu1 }
 0x658   :  { %3932 = vtanh.f32 %v2334_v14  ;;  %3648 = vmatpush3.bf16.msra.mxu0 %v3883_v20 }
 0x659   :  { %v2224_v17 = vpop.f32.mrf.mxu1  ;;  %3649 = vmatprep.subr.bf16.mxu0 %v4011_v0 }
 0x65b   :  { %v3600_v18 = vpop.f32.mrf.mxu1 }
 0x65c   :  { %3650 = vmatpush3.bf16.msra.mxu0 %v3885_v16 }
 0x65d   :  { %3651 = vmatprep.subr.bf16.mxu0 %v4011_v0 }
 0x660   :  { %3652 = vmatpush3.bf16.msra.mxu0 %v3887_v19 }
 0x661   :  { %3653 = vmatprep.subr.bf16.mxu0 %v4011_v0 }
 0x664   :  { %3654 = vmatpush3.bf16.msra.mxu0 %v3889_v21 }
 0x665   :  { %v3933_v23 = vpop.eup %3932  ;;  %3655 = vmatprep.subr.bf16.mxu0 %v4011_v0 }
 0x666   :  { %v2336_v48 = vpack.c.bf16 %v3933_v23, %v3933_v23 }
 0x668   :  { %3656 = vmatpush3.bf16.msra.mxu0 %v3891_v22  ;;  %3638 = vmatmul.mubr.bf16.vlgmr.msra.gmra.mxu1 %v2336_v48 }
 0x669   :  { %3681 = vmatprep.subr.bf16.mxu0 %v4011_v0  ;;  %3677 = vmatprep.mubr.msk.bf16.mxu1 %vm4012_vm0, %v4011_v0 }
 0x66a   :  { %3662 = vmatpush3.bf16.msra.mxu1 %v3892_v24 }
 0x66b   :  { %3658 = vmatmul.mubr.bf16.vlgmr.msra.gmra.mxu0 %v2336_v48  ;;  %3663 = vmatprep.subr.bf16.mxu1 %v4011_v0 }
 0x66c   :  { %3697 = vmatprep.mubr.msk.bf16.mxu0 %vm4012_vm0, %v4011_v0  ;;  %3682 = vmatpush3.bf16.msra.mxu0 %v3893_v25 }
 0x66d   :  { %3683 = vmatprep.subr.bf16.mxu0 %v4011_v0 }
 0x66e   :  { %3664 = vmatpush3.bf16.msra.mxu1 %v3894_v26 }
 0x66f   :  { %3665 = vmatprep.subr.bf16.mxu1 %v4011_v0 }
 0x670   :  { %3684 = vmatpush3.bf16.msra.mxu0 %v3895_v27 }
 0x671   :  { %3685 = vmatprep.subr.bf16.mxu0 %v4011_v0 }
 0x672   :  { %3666 = vmatpush3.bf16.msra.mxu1 %v3896_v28 }
 0x673   :  { %3667 = vmatprep.subr.bf16.mxu1 %v4011_v0 }
 0x674   :  { %3686 = vmatpush3.bf16.msra.mxu0 %v3897_v41 }
 0x675   :  { %3687 = vmatprep.subr.bf16.mxu0 %v4011_v0 }
 0x676   :  { %3668 = vmatpush3.bf16.msra.mxu1 %v3898_v29 }
 0x677   :  { %3669 = vmatprep.subr.bf16.mxu1 %v4011_v0 }
 0x678   :  { %3688 = vmatpush3.bf16.msra.mxu0 %v3899_v30 }
 0x679   :  { %3689 = vmatprep.subr.bf16.mxu0 %v4011_v0 }
 0x67a   :  { %3670 = vmatpush3.bf16.msra.mxu1 %v3900_v31 }
 0x67b   :  { %3671 = vmatprep.subr.bf16.mxu1 %v4011_v0 }
 0x67c   :  { %3690 = vmatpush3.bf16.msra.mxu0 %v3901_v32 }
 0x67d   :  { %3691 = vmatprep.subr.bf16.mxu0 %v4011_v0 }
 0x67e   :  { %3672 = vmatpush3.bf16.msra.mxu1 %v3902_v33 }
 0x67f   :  { %3673 = vmatprep.subr.bf16.mxu1 %v4011_v0 }
 0x680   :  { %3692 = vmatpush3.bf16.msra.mxu0 %v3903_v34 }
 0x681   :  { %3693 = vmatprep.subr.bf16.mxu0 %v4011_v0 }
 0x682   :  { %3674 = vmatpush3.bf16.msra.mxu1 %v3904_v35 }
 0x683   :  { %3675 = vmatprep.subr.bf16.mxu1 %v4011_v0 }
 0x684   :  { %3694 = vmatpush3.bf16.msra.mxu0 %v3905_v36 }
 0x685   :  { %3695 = vmatprep.subr.bf16.mxu0 %v4011_v0 }
 0x686   :  { %3676 = vmatpush3.bf16.msra.mxu1 %v3906_v54 }
 0x688   :  { %3696 = vmatpush3.bf16.msra.mxu0 %v3907_v37 }
 0x70b   :  { %v2326_v38 = vpop.f32.mrf.mxu0 }
 0x70d   :  { %v3619_v39 = vpop.f32.mrf.mxu0 }
 0x70f   :  { %v2329_v40 = vpop.f32.mrf.mxu0 }
 0x711   :  { %v3620_v42 = vpop.f32.mrf.mxu0 }
 0x728   :  { %v2435_v43 = vpop.f32.mrf.mxu1 }
 0x729   :  { %v2436_v45 = vadd.f32 %v2435_v43, %v2326_v38 }
 0x72a   :  { %v3639_v46 = vpop.f32.mrf.mxu1 }
 0x72b   :  { %v2441_v49 = vadd.f32 %v3940_v47, %v2436_v45  ;;  %v2543_v51 = vpop.f32.mrf.mxu0 }
 0x72c   :  { %v2656_v53 = vadd.f32 %v2543_v51, %v4127_v52  ;;  %v2438_v0 = vpop.f32.mrf.mxu1 }
 0x72d   :  { %3934 = vtanh.f32 %v2441_v49  ;;  %v3659_v55 = vpop.f32.mrf.mxu0 }
 0x72e   :  { %3936 = vtanh.f32 %v2656_v53  ;;  %v3640_v56 = vpop.f32.mrf.mxu1 }
 0x72f   :  { %v2546_v57 = vpop.f32.mrf.mxu0 }
 0x731   :  { %v3660_v58 = vpop.f32.mrf.mxu0 }
 0x73a   :  { %v3935_v59 = vpop.eup %3934 }
 0x73b   :  { %v3937_v60 = vpop.eup %3936  ;;  %2444 = vst [vmem:[#allocation9 + $0x30] sm:$0xff] %v3935_v59  ;;  %v2549_v61 = vpack.c.bf16 %v3935_v59, %v3935_v59 }
 0x73c   :  { %v2658_v62 = vpack.c.bf16 %v3937_v60, %v3937_v60 }
 0x73d   :  { %3678 = vmatmul.mubr.bf16.vlgmr.msra.gmra.mxu1 %v2549_v61 }
 0x73e   :  { %3698 = vmatmul.mubr.bf16.vlgmr.msra.gmra.mxu0 %v2658_v62 }
 0x7fd   :  { %v2648_v50 = vpop.f32.mrf.mxu1 }
 0x7fe   :  { %v2757_v63 = vpop.f32.mrf.mxu0 }
 0x7ff   :  { %v2758_v1 = vadd.f32 %v2757_v63, %v2648_v50  ;;  %v3679_v2 = vpop.f32.mrf.mxu1 }
 0x800   :  { %v3699_v3 = vpop.f32.mrf.mxu0 }
 0x801   :  { %v2763_v52 = vadd.f32 %v3940_v47, %v2758_v1  ;;  %v2651_v4 = vpop.f32.mrf.mxu1 }
 0x802   :  { %v2760_v5 = vpop.f32.mrf.mxu0 }
 0x803   :  { %3938 = vtanh.f32 %v2763_v52  ;;  %v3680_v6 = vpop.f32.mrf.mxu1 }
 0x804   :  { %v3700_v7 = vpop.f32.mrf.mxu0 }
 0x810   :  { %v3939_v8 = vpop.eup %3938 }
 0x811   :  { %2766 = vst [vmem:[#allocation9 + $0x38] sm:$0xff] %v3939_v8 }
 0x812   :  { %3992 = shalt.err (!%p3989_p0)
}
 0x813   :  { %s4015_s19 = smov 128   ;;  %s4016_s20 = smov 8  }
 0x814   :  { %2780 = dma.vmem_to_hbm [thread:$0]  %s2775_s17, 1024, %s4358_s5, [#allocation6], %s4015_s19, %s4015_s19, %s4016_s20  }
 0x815   :  { %4005 = dma.done.wait [#allocation6], 1024  }
 0x816   :  { %4006 = vsyncadd [#allocation6], 4294966272 }
 0x817   :  { %2784 = vsyncpa [#allocation5], 1 }
 0x818   :  { %2785 = vsyncpa [#allocation8], 1 }
 0x819   :  { %2786 = vsyncpa [#allocation6], 1 }

</bundles_post_ra>
